<compile_context>
chip_gen: v7x
topology: tpu7x:2x2x1
jax: 0.10.0
libtpu: 0.0.40
codegen_flags: <defaults>
</compile_context>

<pallas_src>
import functools

import jax
import jax.numpy as jnp
from jax.experimental import pallas as pl
from jax.experimental.pallas import tpu as pltpu

_K_IN = 1000      # resnet50 output features (sublane-aligned: 1000 % 8 == 0)
_H1 = 512
_H2 = 256
_LANE = 128
_SUBLANE = 8
_TB_CAP = 512     # batch tile cap (feeds v6e/v7x 256x256 MXU; fine on v5e too)


def _round_up(x, m):
    return (x + m - 1) // m * m


def _head_kernel(am_ref, w1_ref, b1_ref, w2_ref, b2_ref, w3_ref, b3_ref, out_ref):
    """Fused head: linear1 -> ReLU -> (dropout=id) -> linear2 -> ReLU -> (dropout=id)
    -> linear3.  Weights are bf16 and resident in VMEM; activations are cast to bf16
    right before each MXU dot; accumulation is f32."""
    x = am_ref[...].astype(jnp.bfloat16)                                  # [tb, 1000]

    h1 = jnp.dot(x, w1_ref[...], preferred_element_type=jnp.float32) + b1_ref[...]
    h1 = jnp.maximum(h1, 0.0)                                             # ReLU

    h2 = jnp.dot(h1.astype(jnp.bfloat16), w2_ref[...],
                 preferred_element_type=jnp.float32) + b2_ref[...]
    h2 = jnp.maximum(h2, 0.0)                                             # ReLU

    h3 = jnp.dot(h2.astype(jnp.bfloat16), w3_ref[...],
                 preferred_element_type=jnp.float32) + b3_ref[...]
    out_ref[...] = h3.astype(out_ref.dtype)                               # [tb, n_pad]


def prepare_head_params(w1, b1, w2, b2, w3, b3, n_class):
    """One-time weight prep (do this at weight-load/init, NOT per call).

    PyTorch layout (out, in) -> (in, out); weights -> bf16; n_class padded to a
    multiple of 128 (lane-dense output slab).  K stays at 1000 (no pad needed).
    Biases stay f32."""
    n_pad = _round_up(n_class, _LANE)
    w1_t = w1.T.astype(jnp.bfloat16)                                      # [1000, 512]
    w2_t = w2.T.astype(jnp.bfloat16)                                      # [512, 256]
    w3_t = jnp.zeros((_H2, n_pad), jnp.bfloat16)
    w3_t = w3_t.at[:, :n_class].set(w3.T.astype(jnp.bfloat16))            # [256, n_pad]
    b1_2d = b1.reshape(1, _H1).astype(jnp.float32)
    b2_2d = b2.reshape(1, _H2).astype(jnp.float32)
    b3_2d = jnp.zeros((1, n_pad), jnp.float32)
    b3_2d = b3_2d.at[:, :n_class].set(b3.astype(jnp.float32))
    return (w1_t, b1_2d, w2_t, b2_2d, w3_t, b3_2d)


@functools.partial(jax.jit, static_argnames=("n_class",))
def classifie_head(am, params, n_class):
    """am: [B, 1000] f32 (resnet50 backbone output). params: prepare_head_params(...).
    Returns logits [B, n_class] f32."""
    w1_t, b1_2d, w2_t, b2_2d, w3_t, b3_2d = params
    n_pad = w3_t.shape[1]
    B = am.shape[0]

    # Pad B only to a sublane multiple when needed (usually a no-op; never a full
    # tile's worth of extra HBM traffic).
    b8 = _round_up(B, _SUBLANE)
    if b8 != B:
        am = jnp.pad(am, ((0, b8 - B), (0, 0)))

    # Batch tile: multiple of 8, capped at 512; partial last block (if any) only
    # produces garbage in rows >= b8 of no tile, since tb divides b8 when b8 <= cap
    # and pl.cdiv handles the remainder otherwise (row-independent, sliced off).
    tb = min(_TB_CAP, b8)
    grid = (pl.cdiv(b8, tb),)

    const = lambda a: pl.BlockSpec(a.shape, lambda i: (0, 0))  # resident every step

    flops = 2 * b8 * (_K_IN * _H1 + _H1 * _H2 + _H2 * n_pad)
    bytes_accessed = (
        b8 * _K_IN * 4 + b8 * n_pad * 4                                   # act in/out
        + 2 * (_K_IN * _H1 + _H1 * _H2 + _H2 * n_pad)                     # bf16 weights
        + 4 * (_H1 + _H2 + n_pad)                                         # f32 biases
    )

    out = pl.pallas_call(
        _head_kernel,
        out_shape=jax.ShapeDtypeStruct((b8, n_pad), jnp.float32),
        grid_spec=pltpu.PrefetchScalarGridSpec(
            num_scalar_prefetch=0,
            grid=grid,
            in_specs=[
                pl.BlockSpec((tb, _K_IN), lambda i: (i, 0)),  # activations, tiled over B
                const(w1_t), const(b1_2d),
                const(w2_t), const(b2_2d),
                const(w3_t), const(b3_2d),
            ],
            out_specs=pl.BlockSpec((tb, n_pad), lambda i: (i, 0)),
        ),
        compiler_params=pltpu.CompilerParams(
            dimension_semantics=("parallel",),   # megacore-shard / pipeline over batch
            vmem_limit_bytes=24 << 20,           # ~8 MiB live at tb=512
        ),
        cost_estimate=pl.CostEstimate(
            flops=int(flops), transcendentals=0, bytes_accessed=int(bytes_accessed)),
    )(am, w1_t, b1_2d, w2_t, b2_2d, w3_t, b3_2d)

    return out[:B, :n_class]


def _init_linear(key, out_features, in_features):
    """Deterministic PyTorch-default-style init: U(-1/sqrt(in), 1/sqrt(in))."""
    kw, kb = jax.random.split(key)
    bound = 1.0 / (in_features ** 0.5)
    w = jax.random.uniform(kw, (out_features, in_features), jnp.float32,
                           minval=-bound, maxval=bound)
    b = jax.random.uniform(kb, (out_features,), jnp.float32,
                           minval=-bound, maxval=bound)
    return w, b


if __name__ == "__main__":
    n_class = 10
    B = 8

    root = jax.random.PRNGKey(0)
    k_am, k1, k2, k3 = jax.random.split(root, 4)

    # `am` stands in for the 1000-dim resnet50 backbone output (see TODO above).
    am = jax.random.normal(k_am, (B, 1000), dtype=jnp.float32)

    w1, b1 = _init_linear(k1, 512, 1000)
    w2, b2 = _init_linear(k2, 256, 512)
    w3, b3 = _init_linear(k3, n_class, 256)

    # One-time prep (transpose / bf16 / pad) — outside the per-call path.
    params = prepare_head_params(w1, b1, w2, b2, w3, b3, n_class)
    params = jax.tree_util.tree_map(jax.block_until_ready, params)

    out = classifie_head(am, params, n_class)
    out = jax.block_until_ready(out)

    # Reference in plain JAX with the same arithmetic (bf16 operands, f32 accumulate,
    # eval-mode dropout == identity).
    bf = jnp.bfloat16
    ref = jnp.maximum(
        jnp.dot(am.astype(bf), w1.T.astype(bf), preferred_element_type=jnp.float32) + b1, 0.0)
    ref = jnp.maximum(
        jnp.dot(ref.astype(bf), w2.T.astype(bf), preferred_element_type=jnp.float32) + b2, 0.0)
    ref = jnp.dot(ref.astype(bf), w3.T.astype(bf), preferred_element_type=jnp.float32) + b3

    assert out.shape == (B, n_class)
    assert jnp.allclose(out, ref, atol=1e-2, rtol=1e-2), float(jnp.max(jnp.abs(out - ref)))

    print("KERNEL_OK")
</pallas_src>

<mosaic_0001>
module attributes {stable_mosaic.version = 11 : i64} {
  func.func @_head_kernel(%arg0: i32, %arg1: memref<8x1000xf32, #tpu.memory_space<vmem>>, %arg2: memref<1000x512xbf16, #tpu.memory_space<vmem>>, %arg3: memref<1x512xf32, #tpu.memory_space<vmem>>, %arg4: memref<512x256xbf16, #tpu.memory_space<vmem>>, %arg5: memref<1x256xf32, #tpu.memory_space<vmem>>, %arg6: memref<256x128xbf16, #tpu.memory_space<vmem>>, %arg7: memref<1x128xf32, #tpu.memory_space<vmem>>, %arg8: memref<8x128xf32, #tpu.memory_space<vmem>>) attributes {dimension_semantics = [#tpu.dimension_semantics<parallel>], iteration_bounds = array<i64: 1>, scalar_prefetch = 0 : i64, scratch_operands = 0 : i64, tpu.core_type = #tpu.core_type<tc>, window_params = [{transform_indices = @transform_0, window_bounds = array<i64: 8, 1000>}, {pipeline_mode = #tpu.pipeline_mode<synchronous>, transform_indices = @transform_1, window_bounds = array<i64: 1000, 512>}, {pipeline_mode = #tpu.pipeline_mode<synchronous>, transform_indices = @transform_2, window_bounds = array<i64: 1, 512>}, {pipeline_mode = #tpu.pipeline_mode<synchronous>, transform_indices = @transform_3, window_bounds = array<i64: 512, 256>}, {pipeline_mode = #tpu.pipeline_mode<synchronous>, transform_indices = @transform_4, window_bounds = array<i64: 1, 256>}, {pipeline_mode = #tpu.pipeline_mode<synchronous>, transform_indices = @transform_5, window_bounds = array<i64: 256, 128>}, {pipeline_mode = #tpu.pipeline_mode<synchronous>, transform_indices = @transform_6, window_bounds = array<i64: 1, 128>}, {transform_indices = @transform_7, window_bounds = array<i64: 8, 128>}]} {
    %c0 = arith.constant 0 : index
    %c0_0 = arith.constant 0 : index
    %0 = vector.load %arg1[%c0, %c0_0] : memref<8x1000xf32, #tpu.memory_space<vmem>>, vector<8x1000xf32>
    %1 = arith.truncf %0 : vector<8x1000xf32> to vector<8x1000xbf16>
    %c0_1 = arith.constant 0 : index
    %c0_2 = arith.constant 0 : index
    %2 = vector.load %arg2[%c0_1, %c0_2] : memref<1000x512xbf16, #tpu.memory_space<vmem>>, vector<1000x512xbf16>
    %cst = arith.constant dense<0.000000e+00> : vector<8x512xf32>
    %3 = tpu.matmul %1, %2, %cst {dimension_numbers = #tpu.dot_dimension_numbers<[1], [0], [0], [1], [0, 0, 1, 1], [], []>} : vector<8x1000xbf16>, vector<1000x512xbf16>, vector<8x512xf32> -> vector<8x512xf32>
    %c0_3 = arith.constant 0 : index
    %c0_4 = arith.constant 0 : index
    %4 = vector.load %arg3[%c0_3, %c0_4] : memref<1x512xf32, #tpu.memory_space<vmem>>, vector<1x512xf32>
    %5 = vector.broadcast %4 : vector<1x512xf32> to vector<8x512xf32>
    %6 = arith.addf %3, %5 : vector<8x512xf32>
    %cst_5 = arith.constant 0.000000e+00 : f32
    %7 = vector.broadcast %cst_5 : f32 to vector<8x512xf32>
    %8 = arith.maximumf %6, %7 : vector<8x512xf32>
    %9 = arith.truncf %8 : vector<8x512xf32> to vector<8x512xbf16>
    %c0_6 = arith.constant 0 : index
    %c0_7 = arith.constant 0 : index
    %10 = vector.load %arg4[%c0_6, %c0_7] : memref<512x256xbf16, #tpu.memory_space<vmem>>, vector<512x256xbf16>
    %cst_8 = arith.constant dense<0.000000e+00> : vector<8x256xf32>
    %11 = tpu.matmul %9, %10, %cst_8 {dimension_numbers = #tpu.dot_dimension_numbers<[1], [0], [0], [1], [0, 0, 1, 1], [], []>} : vector<8x512xbf16>, vector<512x256xbf16>, vector<8x256xf32> -> vector<8x256xf32>
    %c0_9 = arith.constant 0 : index
    %c0_10 = arith.constant 0 : index
    %12 = vector.load %arg5[%c0_9, %c0_10] : memref<1x256xf32, #tpu.memory_space<vmem>>, vector<1x256xf32>
    %13 = vector.broadcast %12 : vector<1x256xf32> to vector<8x256xf32>
    %14 = arith.addf %11, %13 : vector<8x256xf32>
    %cst_11 = arith.constant 0.000000e+00 : f32
    %15 = vector.broadcast %cst_11 : f32 to vector<8x256xf32>
    %16 = arith.maximumf %14, %15 : vector<8x256xf32>
    %17 = arith.truncf %16 : vector<8x256xf32> to vector<8x256xbf16>
    %c0_12 = arith.constant 0 : index
    %c0_13 = arith.constant 0 : index
    %18 = vector.load %arg6[%c0_12, %c0_13] : memref<256x128xbf16, #tpu.memory_space<vmem>>, vector<256x128xbf16>
    %cst_14 = arith.constant dense<0.000000e+00> : vector<8x128xf32>
    %19 = tpu.matmul %17, %18, %cst_14 {dimension_numbers = #tpu.dot_dimension_numbers<[1], [0], [0], [1], [0, 0, 1, 1], [], []>} : vector<8x256xbf16>, vector<256x128xbf16>, vector<8x128xf32> -> vector<8x128xf32>
    %c0_15 = arith.constant 0 : index
    %c0_16 = arith.constant 0 : index
    %20 = vector.load %arg7[%c0_15, %c0_16] : memref<1x128xf32, #tpu.memory_space<vmem>>, vector<1x128xf32>
    %21 = vector.broadcast %20 : vector<1x128xf32> to vector<8x128xf32>
    %22 = arith.addf %19, %21 : vector<8x128xf32>
    %c0_17 = arith.constant 0 : index
    %c0_18 = arith.constant 0 : index
    %23 = vector.load %arg8[%c0_17, %c0_18] : memref<8x128xf32, #tpu.memory_space<vmem>>, vector<8x128xf32>
    tpu.vector_store %arg8[%c0_17, %c0_18], %22 {strides = array<i32>} : memref<8x128xf32, #tpu.memory_space<vmem>>, vector<8x128xf32>,
    return
  }
  func.func @transform_0(%arg0: i32) -> (i32, i32) {
    %c0_i32 = arith.constant 0 : i32
    %c0_i32_0 = arith.constant 0 : i32
    return %arg0, %c0_i32 : i32, i32
  }
  func.func @transform_1(%arg0: i32) -> (i32, i32) {
    %c0_i32 = arith.constant 0 : i32
    %c0_i32_0 = arith.constant 0 : i32
    %c0_i32_1 = arith.constant 0 : i32
    return %c0_i32, %c0_i32_0 : i32, i32
  }
  func.func @transform_2(%arg0: i32) -> (i32, i32) {
    %c0_i32 = arith.constant 0 : i32
    %c0_i32_0 = arith.constant 0 : i32
    %c0_i32_1 = arith.constant 0 : i32
    return %c0_i32, %c0_i32_0 : i32, i32
  }
  func.func @transform_3(%arg0: i32) -> (i32, i32) {
    %c0_i32 = arith.constant 0 : i32
    %c0_i32_0 = arith.constant 0 : i32
    %c0_i32_1 = arith.constant 0 : i32
    return %c0_i32, %c0_i32_0 : i32, i32
  }
  func.func @transform_4(%arg0: i32) -> (i32, i32) {
    %c0_i32 = arith.constant 0 : i32
    %c0_i32_0 = arith.constant 0 : i32
    %c0_i32_1 = arith.constant 0 : i32
    return %c0_i32, %c0_i32_0 : i32, i32
  }
  func.func @transform_5(%arg0: i32) -> (i32, i32) {
    %c0_i32 = arith.constant 0 : i32
    %c0_i32_0 = arith.constant 0 : i32
    %c0_i32_1 = arith.constant 0 : i32
    return %c0_i32, %c0_i32_0 : i32, i32
  }
  func.func @transform_6(%arg0: i32) -> (i32, i32) {
    %c0_i32 = arith.constant 0 : i32
    %c0_i32_0 = arith.constant 0 : i32
    %c0_i32_1 = arith.constant 0 : i32
    return %c0_i32, %c0_i32_0 : i32, i32
  }
  func.func @transform_7(%arg0: i32) -> (i32, i32) {
    %c0_i32 = arith.constant 0 : i32
    %c0_i32_0 = arith.constant 0 : i32
    return %arg0, %c0_i32 : i32, i32
  }
}

</mosaic_0001>

<bundles_post_ra>
// kernel: classifie_head.1
= control target key start
LH: loop header
LB: loop body
LE: loop exit
PB: predicated region body
PF: predicated region fallthrough
CT: control target
= control target key end

     0   :  { %12 = vsyncpa [#allocation3], 0  ;;  %s3835_s0 = inlined_call_operand.hbm [shape: f32[8,1000], index: 0, kind: input, shape index: {}]   ;;  %s3836_s1 = inlined_call_operand.hbm [shape: bf16[1000,512], index: 1, kind: input, shape index: {}]   ;;  %s3837_s2 = inlined_call_operand.vmem [shape: f32[1,512], index: 2, kind: input, shape index: {}]   ;;  %s3838_s3 = inlined_call_operand.hbm [shape: bf16[512,256], index: 3, kind: input, shape index: {}]   ;;  %s3839_s4 = inlined_call_operand.vmem [shape: f32[1,256], index: 4, kind: input, shape index: {}]   ;;  %s3840_s5 = inlined_call_operand.hbm [shape: bf16[256,128], index: 5, kind: input, shape index: {}]   ;;  %s3841_s6 = inlined_call_operand.vmem [shape: f32[1,128], index: 6, kind: input, shape index: {}]   ;;  %s3842_s7 = inlined_call_operand.hbm [shape: f32[8,128], index: 7, kind: output, shape index: {}]  }
   0x1   :  { %13 = vsyncpa [#allocation6], 0 }
   0x2   :  { %14 = vsyncpa [#allocation9], 0 }
   0x3   :  { %15 = vsyncpa [#allocation4], 0  ;;  %s3655_s24 = smov [#allocation5]   ;;  %s3537_s28 = scalar_lea.hbm %s3836_s1, 32000 }
   0x4   :  { %s31_s25 = sshll.u32 %s3655_s24, 4  ;;  %p3538_p0 = scmp.ne.s32.totalorder %s3836_s1, %s3537_s28  ;;  %s32_s25 = int_to_ptr.vmem [resolvable:$true] %s31_s25 }
   0x5   :  { %p3541_p1 = scmp.lt.u32.totalorder %s3537_s28, %s3836_s1 }
   0x7   :  { %p3543_p2 = pnand %p3541_p1, %p3538_p0 }
   0x9   :  { %3546 = shalt.err (!%p3543_p2)
}
   0xa   :  { %s3547_s10 = scalar_lea.vmem %s32_s25, 32000  ;;  %p3552_p4 = scmp.lt.s32.totalorder %s32_s25, %s32_s25 }
   0xb   :  { %p3548_p3 = scmp.ne.s32.totalorder %s32_s25, %s3547_s10  ;;  %p3553_p5 = scmp.lt.s32.totalorder %s3547_s10, %s3547_s10 }
   0xd   :  { %p3554_p6 = por %p3553_p5, %p3552_p4 }
   0xf   :  { %p3555_p7 = pnand %p3554_p6, %p3548_p3 }
  0x11   :  { %3558 = shalt.err (!%p3555_p7)
}
  0x12   :  { %s3656_s11 = smov 256   ;;  %s3657_s12 = smov 16  }
  0x13   :  { %37 = dma.hbm_to_vmem [thread:$0]  %s3836_s1, 32000, %s32_s25, [#allocation6], %s3656_s11, %s3656_s11, %s3657_s12  }
  0x14   :  { %s3658_s15 = smov [#allocation2]   ;;  %s3659_s17 = smov [#allocation7]  }
  0x15   :  { %s22_s16 = sshll.u32 %s3658_s15, 4  ;;  %s45_s18 = sshll.u32 %s3659_s17, 4  ;;  %s23_s16 = int_to_ptr.vmem [resolvable:$true] %s22_s16  ;;  %s46_s18 = int_to_ptr.vmem [resolvable:$true] %s45_s18 }
  0x16   :  { %s3559_s21 = scalar_lea.hbm %s3835_s0, 1024 }
  0x17   :  { %p3560_p8 = scmp.ne.s32.totalorder %s3835_s0, %s3559_s21  ;;  %p3563_p9 = scmp.lt.u32.totalorder %s3559_s21, %s3835_s0 }
  0x19   :  { %p3565_p10 = pnand %p3563_p9, %p3560_p8 }
  0x1b   :  { %3568 = shalt.err (!%p3565_p10)
}
  0x1c   :  { %s3569_s1 = scalar_lea.vmem %s23_s16, 1024  ;;  %p3574_p12 = scmp.lt.s32.totalorder %s23_s16, %s23_s16 }
  0x1d   :  { %p3570_p11 = scmp.ne.s32.totalorder %s23_s16, %s3569_s1  ;;  %p3575_p13 = scmp.lt.s32.totalorder %s3569_s1, %s3569_s1 }
  0x1f   :  { %p3576_p0 = por %p3575_p13, %p3574_p12 }
  0x21   :  { %p3577_p1 = pnand %p3576_p0, %p3570_p11 }
  0x23   :  { %3580 = shalt.err (!%p3577_p1)
}
  0x24   :  { %25 = dma.hbm_to_vmem [thread:$0]  %s3835_s0, 1024, %s23_s16, [#allocation3]  }
  0x25   :  { %s3581_s30 = scalar_lea.hbm %s3838_s3, 8192 }
  0x26   :  { %p3582_p2 = scmp.ne.s32.totalorder %s3838_s3, %s3581_s30  ;;  %p3585_p3 = scmp.lt.u32.totalorder %s3581_s30, %s3838_s3 }
  0x28   :  { %p3587_p4 = pnand %p3585_p3, %p3582_p2 }
  0x2a   :  { %3590 = shalt.err (!%p3587_p4)
}
  0x2b   :  { %s3591_s12 = scalar_lea.vmem %s46_s18, 8192  ;;  %p3596_p6 = scmp.lt.s32.totalorder %s46_s18, %s46_s18 }
  0x2c   :  { %p3592_p5 = scmp.ne.s32.totalorder %s46_s18, %s3591_s12  ;;  %p3597_p7 = scmp.lt.s32.totalorder %s3591_s12, %s3591_s12 }
  0x2e   :  { %p3598_p8 = por %p3597_p7, %p3596_p6 }
  0x30   :  { %p3599_p9 = pnand %p3598_p8, %p3592_p5 }
  0x32   :  { %3602 = shalt.err (!%p3599_p9)
}
  0x33   :  { %s3660_s0 = smov 128   ;;  %s3661_s13 = smov 8  }
  0x34   :  { %51 = dma.hbm_to_vmem [thread:$0]  %s3838_s3, 8192, %s46_s18, [#allocation6], %s3660_s0, %s3660_s0, %s3661_s13  }
  0x35   :  { %s3662_s16 = smov [#allocation8]   ;;  %s3603_s21 = scalar_lea.hbm %s3840_s5, 2048 }
  0x36   :  { %s59_s17 = sshll.u32 %s3662_s16, 4  ;;  %p3604_p10 = scmp.ne.s32.totalorder %s3840_s5, %s3603_s21  ;;  %s60_s17 = int_to_ptr.vmem [resolvable:$true] %s59_s17 }
  0x37   :  { %p3607_p11 = scmp.lt.u32.totalorder %s3603_s21, %s3840_s5 }
  0x39   :  { %p3609_p12 = pnand %p3607_p11, %p3604_p10 }
  0x3b   :  { %3612 = shalt.err (!%p3609_p12)
}
  0x3c   :  { %s3613_s1 = scalar_lea.vmem %s60_s17, 2048  ;;  %p3618_p0 = scmp.lt.s32.totalorder %s60_s17, %s60_s17 }
  0x3d   :  { %p3614_p13 = scmp.ne.s32.totalorder %s60_s17, %s3613_s1  ;;  %p3619_p1 = scmp.lt.s32.totalorder %s3613_s1, %s3613_s1 }
  0x3f   :  { %p3620_p2 = por %p3619_p1, %p3618_p0 }
  0x41   :  { %p3621_p3 = pnand %p3620_p2, %p3614_p13 }
  0x43   :  { %3624 = shalt.err (!%p3621_p3)
}
  0x44   :  { %s3663_s3 = smov 64   ;;  %s3664_s18 = smov 4  }
  0x45   :  { %65 = dma.hbm_to_vmem [thread:$0]  %s3840_s5, 2048, %s60_s17, [#allocation9], %s3663_s3, %s3663_s3, %s3664_s18  }
  0x46   :  { %3647 = dma.done.wait [#allocation3], 1024  }
  0x47   :  { %3648 = vsyncadd [#allocation3], 4294966272 }
  0x48   :  { %3649 = dma.done.wait [#allocation6], 40192  }
  0x49   :  { %3650 = vsyncadd [#allocation6], 4294927104 }
  0x4a   :  { %3651 = dma.done.wait [#allocation9], 2048  }
  0x4b   :  { %3652 = vsyncadd [#allocation9], 4294965248  ;;  %v3049_v0 = vld [vmem:[#allocation5 + $0x4] ss:$16 sps:$4 sm:$0xff]   ;;  %v3053_v2 = vld [vmem:[#allocation5] ss:$16 sps:$4 sm:$0xff]  }
  0x4c   :  { %v3051_v1 = vld [vmem:[#allocation5 + $0x604] ss:$16 sps:$4 sm:$0xff]   ;;  %1636 = vmatprep.subr.bf16.mxu0 %v3049_v0  ;;  %v3054_v3 = vld [vmem:[#allocation5 + $0x600] ss:$16 sps:$4 sm:$0xff]   ;;  %v88_v42 = vld [vmem:[#allocation2 + $0x38] sm:$0xff]  ;;  %vm1619_vm0 = vcmask 850944  }
  0x4d   :  { %1759 = vmatprep.subr.bf16.mxu1 %v3051_v1  ;;  %v3055_v4 = vld [vmem:[#allocation5 + $0x24] ss:$16 sps:$4 sm:$0xff]   ;;  %1637 = vmatpush1.bf16.msra.mxu0 %v3053_v2  ;;  %v3059_v6 = vld [vmem:[#allocation5 + $0x20] ss:$16 sps:$4 sm:$0xff]   ;;  %v3754_v45 = vpack.c.bf16 %v88_v42, %v88_v42  ;;  %v82_v48 = vld [vmem:[#allocation2 + $0x8] sm:$0xff]  ;;  %vm1623_vm1 = vcmask 1043456  }
  0x4e   :  { %1760 = vmatpush1.bf16.msra.mxu1 %v3054_v3  ;;  %v3057_v5 = vld [vmem:[#allocation5 + $0x624] ss:$16 sps:$4 sm:$0xff]   ;;  %1638 = vmatprep.subr.bf16.mxu0 %v3055_v4  ;;  %v3060_v7 = vld [vmem:[#allocation5 + $0x620] ss:$16 sps:$4 sm:$0xff]   ;;  %v90_v50 = vpack.c.bf16 %v82_v48, %v82_v48  ;;  %v3142_v4 = vld [vmem:[#allocation5 + $0xc] ss:$16 sps:$4 sm:$0xff]  }
  0x4f   :  { %1761 = vmatprep.subr.bf16.mxu1 %v3057_v5  ;;  %v3061_v8 = vld [vmem:[#allocation5 + $0x44] ss:$16 sps:$4 sm:$0xff]   ;;  %v3065_v10 = vld [vmem:[#allocation5 + $0x40] ss:$16 sps:$4 sm:$0xff]   ;;  %2900 = vmatprep.mubr.msk.bf16.mxu1 %vm1619_vm0, %v3754_v45  ;;  %v3140_v5 = vld [vmem:[#allocation5 + $0x8] ss:$16 sps:$4 sm:$0xff]  }
  0x50   :  { %v3063_v9 = vld [vmem:[#allocation5 + $0x644] ss:$16 sps:$4 sm:$0xff]   ;;  %v3066_v11 = vld [vmem:[#allocation5 + $0x640] ss:$16 sps:$4 sm:$0xff]   ;;  %1668 = vmatprep.mubr.bf16.mxu0 %v90_v50  ;;  %v3195_v48 = vld [vmem:[#allocation5 + $0x128] ss:$16 sps:$4 sm:$0xff]  }
  0x51   :  { %1639 = vmatpush1.bf16.msra.mxu0 %v3059_v6  ;;  %v3067_v12 = vld [vmem:[#allocation5 + $0x64] ss:$16 sps:$4 sm:$0xff]   ;;  %v3071_v14 = vld [vmem:[#allocation5 + $0x60] ss:$16 sps:$4 sm:$0xff]   ;;  %s3665_s8 = smov [#allocation10]  }
  0x52   :  { %1762 = vmatpush1.bf16.msra.mxu1 %v3060_v7  ;;  %1640 = vmatprep.subr.bf16.mxu0 %v3061_v8  ;;  %v3069_v13 = vld [vmem:[#allocation5 + $0x664] ss:$16 sps:$4 sm:$0xff]   ;;  %v3072_v15 = vld [vmem:[#allocation5 + $0x660] ss:$16 sps:$4 sm:$0xff]   ;;  %s2636_s9 = sshll.u32 %s3665_s8, 4  ;;  %s2637_s9 = int_to_ptr.vmem [resolvable:$true] %s2636_s9 }
  0x53   :  { %1763 = vmatprep.subr.bf16.mxu1 %v3063_v9  ;;  %v3073_v16 = vld [vmem:[#allocation5 + $0x84] ss:$16 sps:$4 sm:$0xff]   ;;  %v3077_v18 = vld [vmem:[#allocation5 + $0x80] ss:$16 sps:$4 sm:$0xff]   ;;  %s3625_s10 = scalar_lea.vmem %s2637_s9, 128  ;;  %p3630_p5 = scmp.lt.s32.totalorder %s2637_s9, %s2637_s9 }
  0x54   :  { %v3075_v17 = vld [vmem:[#allocation5 + $0x684] ss:$16 sps:$4 sm:$0xff]   ;;  %v3078_v19 = vld [vmem:[#allocation5 + $0x680] ss:$16 sps:$4 sm:$0xff]   ;;  %p3626_p4 = scmp.ne.s32.totalorder %s2637_s9, %s3625_s10  ;;  %p3631_p6 = scmp.lt.s32.totalorder %s3625_s10, %s3625_s10 }
  0x55   :  { %1641 = vmatpush1.bf16.msra.mxu0 %v3065_v10  ;;  %v3079_v20 = vld [vmem:[#allocation5 + $0xa4] ss:$16 sps:$4 sm:$0xff]   ;;  %v3083_v22 = vld [vmem:[#allocation5 + $0xa0] ss:$16 sps:$4 sm:$0xff]   ;;  %v3149_v10 = vld [vmem:[#allocation5 + $0x2c] ss:$16 sps:$4 sm:$0xff]  }
  0x56   :  { %1764 = vmatpush1.bf16.msra.mxu1 %v3066_v11  ;;  %1642 = vmatprep.subr.bf16.mxu0 %v3067_v12  ;;  %v3081_v21 = vld [vmem:[#allocation5 + $0x6a4] ss:$16 sps:$4 sm:$0xff]   ;;  %v3084_v23 = vld [vmem:[#allocation5 + $0x6a0] ss:$16 sps:$4 sm:$0xff]   ;;  %p3632_p7 = por %p3631_p6, %p3630_p5 }
  0x57   :  { %1765 = vmatprep.subr.bf16.mxu1 %v3069_v13  ;;  %v3085_v24 = vld [vmem:[#allocation5 + $0xc4] ss:$16 sps:$4 sm:$0xff]   ;;  %v3089_v26 = vld [vmem:[#allocation5 + $0xc0] ss:$16 sps:$4 sm:$0xff]   ;;  %v3147_v13 = vld [vmem:[#allocation5 + $0x28] ss:$16 sps:$4 sm:$0xff]  }
  0x58   :  { %v3087_v25 = vld [vmem:[#allocation5 + $0x6c4] ss:$16 sps:$4 sm:$0xff]   ;;  %v3090_v27 = vld [vmem:[#allocation5 + $0x6c0] ss:$16 sps:$4 sm:$0xff]   ;;  %p3633_p8 = pnand %p3632_p7, %p3626_p4 }
  0x59   :  { %1643 = vmatpush1.bf16.msra.mxu0 %v3071_v14  ;;  %v3091_v28 = vld [vmem:[#allocation5 + $0xe4] ss:$16 sps:$4 sm:$0xff]   ;;  %v3095_v30 = vld [vmem:[#allocation5 + $0xe0] ss:$16 sps:$4 sm:$0xff]  }
  0x5a   :  { %1766 = vmatpush1.bf16.msra.mxu1 %v3072_v15  ;;  %1644 = vmatprep.subr.bf16.mxu0 %v3073_v16  ;;  %v3093_v29 = vld [vmem:[#allocation5 + $0x6e4] ss:$16 sps:$4 sm:$0xff]   ;;  %v3096_v31 = vld [vmem:[#allocation5 + $0x6e0] ss:$16 sps:$4 sm:$0xff]   ;;  %v3155_v15 = vld [vmem:[#allocation5 + $0x4c] ss:$16 sps:$4 sm:$0xff]  }
  0x5b   :  { %1767 = vmatprep.subr.bf16.mxu1 %v3075_v17  ;;  %v3097_v32 = vld [vmem:[#allocation5 + $0x104] ss:$16 sps:$4 sm:$0xff]   ;;  %v3101_v34 = vld [vmem:[#allocation5 + $0x100] ss:$16 sps:$4 sm:$0xff]   ;;  %v3153_v17 = vld [vmem:[#allocation5 + $0x48] ss:$16 sps:$4 sm:$0xff]  }
  0x5c   :  { %v3099_v33 = vld [vmem:[#allocation5 + $0x704] ss:$16 sps:$4 sm:$0xff]   ;;  %v3102_v35 = vld [vmem:[#allocation5 + $0x700] ss:$16 sps:$4 sm:$0xff]  }
  0x5d   :  { %1645 = vmatpush1.bf16.msra.mxu0 %v3077_v18  ;;  %v3103_v36 = vld [vmem:[#allocation5 + $0x124] ss:$16 sps:$4 sm:$0xff]   ;;  %v3107_v38 = vld [vmem:[#allocation5 + $0x120] ss:$16 sps:$4 sm:$0xff]  }
  0x5e   :  { %1768 = vmatpush1.bf16.msra.mxu1 %v3078_v19  ;;  %1646 = vmatprep.subr.bf16.mxu0 %v3079_v20  ;;  %v3105_v37 = vld [vmem:[#allocation5 + $0x724] ss:$16 sps:$4 sm:$0xff]   ;;  %v3108_v39 = vld [vmem:[#allocation5 + $0x720] ss:$16 sps:$4 sm:$0xff]   ;;  %v3161_v19 = vld [vmem:[#allocation5 + $0x6c] ss:$16 sps:$4 sm:$0xff]  }
  0x5f   :  { %1769 = vmatprep.subr.bf16.mxu1 %v3081_v21  ;;  %v3109_v40 = vld [vmem:[#allocation5 + $0x144] ss:$16 sps:$4 sm:$0xff]   ;;  %v3113_v43 = vld [vmem:[#allocation5 + $0x140] ss:$16 sps:$4 sm:$0xff]   ;;  %v3159_v21 = vld [vmem:[#allocation5 + $0x68] ss:$16 sps:$4 sm:$0xff]  }
  0x60   :  { %v3111_v41 = vld [vmem:[#allocation5 + $0x744] ss:$16 sps:$4 sm:$0xff]   ;;  %v3114_v44 = vld [vmem:[#allocation5 + $0x740] ss:$16 sps:$4 sm:$0xff]  }
  0x61   :  { %1647 = vmatpush1.bf16.msra.mxu0 %v3083_v22  ;;  %v3115_v46 = vld [vmem:[#allocation5 + $0x164] ss:$16 sps:$4 sm:$0xff]   ;;  %v3119_v49 = vld [vmem:[#allocation5 + $0x160] ss:$16 sps:$4 sm:$0xff]  }
  0x62   :  { %1770 = vmatpush1.bf16.msra.mxu1 %v3084_v23  ;;  %1648 = vmatprep.subr.bf16.mxu0 %v3085_v24  ;;  %v3117_v47 = vld [vmem:[#allocation5 + $0x764] ss:$16 sps:$4 sm:$0xff]   ;;  %v3120_v51 = vld [vmem:[#allocation5 + $0x760] ss:$16 sps:$4 sm:$0xff]   ;;  %v3167_v23 = vld [vmem:[#allocation5 + $0x8c] ss:$16 sps:$4 sm:$0xff]  }
  0x63   :  { %1771 = vmatprep.subr.bf16.mxu1 %v3087_v25  ;;  %v3121_v52 = vld [vmem:[#allocation5 + $0x184] ss:$16 sps:$4 sm:$0xff]   ;;  %v3125_v54 = vld [vmem:[#allocation5 + $0x180] ss:$16 sps:$4 sm:$0xff]   ;;  %v3165_v25 = vld [vmem:[#allocation5 + $0x88] ss:$16 sps:$4 sm:$0xff]  }
  0x64   :  { %v3123_v53 = vld [vmem:[#allocation5 + $0x784] ss:$16 sps:$4 sm:$0xff]   ;;  %v3126_v55 = vld [vmem:[#allocation5 + $0x780] ss:$16 sps:$4 sm:$0xff]  }
  0x65   :  { %1649 = vmatpush1.bf16.msra.mxu0 %v3089_v26  ;;  %v3127_v56 = vld [vmem:[#allocation5 + $0x1a4] ss:$16 sps:$4 sm:$0xff]   ;;  %v3131_v59 = vld [vmem:[#allocation5 + $0x1a0] ss:$16 sps:$4 sm:$0xff]  }
  0x66   :  { %1772 = vmatpush1.bf16.msra.mxu1 %v3090_v27  ;;  %1650 = vmatprep.subr.bf16.mxu0 %v3091_v28  ;;  %v3129_v57 = vld [vmem:[#allocation5 + $0x7a4] ss:$16 sps:$4 sm:$0xff]   ;;  %v3132_v60 = vld [vmem:[#allocation5 + $0x7a0] ss:$16 sps:$4 sm:$0xff]   ;;  %v3173_v27 = vld [vmem:[#allocation5 + $0xac] ss:$16 sps:$4 sm:$0xff]  }
  0x67   :  { %1773 = vmatprep.subr.bf16.mxu1 %v3093_v29  ;;  %v345_v58 = vld [vmem:[#allocation5 + $0x7c0] sm:$0xff]  ;;  %v87_v1 = vld [vmem:[#allocation2 + $0x30] sm:$0xff]  ;;  %v3171_v29 = vld [vmem:[#allocation5 + $0xa8] ss:$16 sps:$4 sm:$0xff]  }
  0x68   :  { %v3133_v61 = vld [vmem:[#allocation5 + $0x1c4] ss:$16 sps:$4 sm:$0xff]   ;;  %v2896_v62 = vcombine.high %v345_v58, %v345_v58  ;;  %v2895_v63 = vcombine.low %v345_v58, %v345_v58  ;;  %v3136_v0 = vld [vmem:[#allocation5 + $0x1c0] ss:$16 sps:$4 sm:$0xff]   ;;  %v3760_v6 = vpack.c.bf16 %v87_v1, %v87_v1  ;;  %v3215_v58 = vld [vmem:[#allocation5 + $0x18c] ss:$16 sps:$4 sm:$0xff]  }
  0x69   :  { %1651 = vmatpush1.bf16.msra.mxu0 %v3095_v30  ;;  %v3138_v3 = vld [vmem:[#allocation5 + $0x1e4] ss:$16 sps:$4 sm:$0xff]   ;;  %v3143_v7 = vld [vmem:[#allocation5 + $0x1e0] ss:$16 sps:$4 sm:$0xff]  }
  0x6a   :  { %1774 = vmatpush1.bf16.msra.mxu1 %v3096_v31  ;;  %1652 = vmatprep.subr.bf16.mxu0 %v3097_v32  ;;  %v1625_v2 = vsel %vm1623_vm1, %v2895_v63, 0  ;;  %v81_v8 = vld [vmem:[#allocation2] sm:$0xff]  ;;  %v3179_v31 = vld [vmem:[#allocation5 + $0xcc] ss:$16 sps:$4 sm:$0xff]  }
  0x6b   :  { %1775 = vmatprep.subr.bf16.mxu1 %v3099_v33  ;;  %v3146_v9 = vld [vmem:[#allocation5 + $0x204] ss:$16 sps:$4 sm:$0xff]   ;;  %v3144_v11 = vld [vmem:[#allocation5 + $0x200] ss:$16 sps:$4 sm:$0xff]   ;;  %v3763_v12 = vpack.c.bf16 %v81_v8, %v81_v8  ;;  %v3177_v33 = vld [vmem:[#allocation5 + $0xc8] ss:$16 sps:$4 sm:$0xff]  }
  0x6c   :  { %v3152_v14 = vld [vmem:[#allocation5 + $0x224] ss:$16 sps:$4 sm:$0xff]   ;;  %v3150_v16 = vld [vmem:[#allocation5 + $0x220] ss:$16 sps:$4 sm:$0xff]  }
  0x6d   :  { %1653 = vmatpush1.bf16.msra.mxu0 %v3101_v34  ;;  %v3158_v18 = vld [vmem:[#allocation5 + $0x244] ss:$16 sps:$4 sm:$0xff]   ;;  %v3156_v20 = vld [vmem:[#allocation5 + $0x240] ss:$16 sps:$4 sm:$0xff]  }
  0x6e   :  { %1776 = vmatpush1.bf16.msra.mxu1 %v3102_v35  ;;  %1654 = vmatprep.subr.bf16.mxu0 %v3103_v36  ;;  %v3164_v22 = vld [vmem:[#allocation5 + $0x264] ss:$16 sps:$4 sm:$0xff]   ;;  %v3162_v24 = vld [vmem:[#allocation5 + $0x260] ss:$16 sps:$4 sm:$0xff]   ;;  %v3185_v35 = vld [vmem:[#allocation5 + $0xec] ss:$16 sps:$4 sm:$0xff]  }
  0x6f   :  { %1777 = vmatprep.subr.bf16.mxu1 %v3105_v37  ;;  %v3170_v26 = vld [vmem:[#allocation5 + $0x284] ss:$16 sps:$4 sm:$0xff]   ;;  %v3168_v28 = vld [vmem:[#allocation5 + $0x280] ss:$16 sps:$4 sm:$0xff]   ;;  %v84_v36 = vld [vmem:[#allocation2 + $0x18] sm:$0xff] }
  0x70   :  { %v3176_v30 = vld [vmem:[#allocation5 + $0x2a4] ss:$16 sps:$4 sm:$0xff]   ;;  %v3174_v32 = vld [vmem:[#allocation5 + $0x2a0] ss:$16 sps:$4 sm:$0xff]   ;;  %v3766_v37 = vpack.c.bf16 %v84_v36, %v84_v36 }
  0x71   :  { %1655 = vmatpush1.bf16.msra.mxu0 %v3107_v38  ;;  %v3182_v34 = vld [vmem:[#allocation5 + $0x2c4] ss:$16 sps:$4 sm:$0xff]   ;;  %v3180_v38 = vld [vmem:[#allocation5 + $0x2c0] ss:$16 sps:$4 sm:$0xff]  }
  0x72   :  { %1778 = vmatpush1.bf16.msra.mxu1 %v3108_v39  ;;  %1656 = vmatprep.subr.bf16.mxu0 %v3109_v40  ;;  %v3183_v39 = vld [vmem:[#allocation5 + $0xe8] ss:$16 sps:$4 sm:$0xff]   ;;  %v3188_v40 = vld [vmem:[#allocation5 + $0x2e4] ss:$16 sps:$4 sm:$0xff]   ;;  %v3186_v42 = vld [vmem:[#allocation5 + $0x2e0] ss:$16 sps:$4 sm:$0xff]  }
  0x73   :  { %1779 = vmatprep.subr.bf16.mxu1 %v3111_v41  ;;  %v3191_v41 = vld [vmem:[#allocation5 + $0x10c] ss:$16 sps:$4 sm:$0xff]   ;;  %v3216_v63 = vld [vmem:[#allocation5 + $0x380] ss:$16 sps:$4 sm:$0xff]   ;;  %v3224_v1 = vld [vmem:[#allocation5 + $0x3a4] ss:$16 sps:$4 sm:$0xff]  }
  0x74   :  { %v3228_v8 = vld [vmem:[#allocation5 + $0x3c0] ss:$16 sps:$4 sm:$0xff]  }
  0x75   :  { %1657 = vmatpush1.bf16.msra.mxu0 %v3113_v43  ;;  %v3189_v43 = vld [vmem:[#allocation5 + $0x108] ss:$16 sps:$4 sm:$0xff]   ;;  %v3264_v36 = vld [vmem:[#allocation5 + $0x480] ss:$16 sps:$4 sm:$0xff]  }
  0x76   :  { %1780 = vmatpush1.bf16.msra.mxu1 %v3114_v44  ;;  %1658 = vmatprep.subr.bf16.mxu0 %v3115_v46  ;;  %v3194_v44 = vld [vmem:[#allocation5 + $0x304] ss:$16 sps:$4 sm:$0xff]   ;;  %v3197_v46 = vld [vmem:[#allocation5 + $0x12c] ss:$16 sps:$4 sm:$0xff]  }
  0x77   :  { %1781 = vmatprep.subr.bf16.mxu1 %v3117_v47  ;;  %v3192_v47 = vld [vmem:[#allocation5 + $0x300] ss:$16 sps:$4 sm:$0xff]  }
  0x79   :  { %1659 = vmatpush1.bf16.msra.mxu0 %v3119_v49  ;;  %v3200_v49 = vld [vmem:[#allocation5 + $0x324] ss:$16 sps:$4 sm:$0xff]  }
  0x7a   :  { %1782 = vmatpush1.bf16.msra.mxu1 %v3120_v51  ;;  %1660 = vmatprep.subr.bf16.mxu0 %v3121_v52  ;;  %v3198_v51 = vld [vmem:[#allocation5 + $0x320] ss:$16 sps:$4 sm:$0xff]   ;;  %v3201_v52 = vld [vmem:[#allocation5 + $0x148] ss:$16 sps:$4 sm:$0xff]  }
  0x7b   :  { %1783 = vmatprep.subr.bf16.mxu1 %v3123_v53  ;;  %v3206_v53 = vld [vmem:[#allocation5 + $0x344] ss:$16 sps:$4 sm:$0xff]  }
  0x7d   :  { %1661 = vmatpush1.bf16.msra.mxu0 %v3125_v54  ;;  %v3209_v54 = vld [vmem:[#allocation5 + $0x16c] ss:$16 sps:$4 sm:$0xff]  }
  0x7e   :  { %1784 = vmatpush1.bf16.msra.mxu1 %v3126_v55  ;;  %1662 = vmatprep.subr.bf16.mxu0 %v3127_v56  ;;  %v3204_v55 = vld [vmem:[#allocation5 + $0x340] ss:$16 sps:$4 sm:$0xff]   ;;  %v3207_v56 = vld [vmem:[#allocation5 + $0x168] ss:$16 sps:$4 sm:$0xff]  }
  0x7f   :  { %1785 = vmatprep.subr.bf16.mxu1 %v3129_v57  ;;  %v3212_v57 = vld [vmem:[#allocation5 + $0x364] ss:$16 sps:$4 sm:$0xff]  }
  0x81   :  { %1663 = vmatpush1.bf16.msra.mxu0 %v3131_v59  ;;  %v3210_v59 = vld [vmem:[#allocation5 + $0x360] ss:$16 sps:$4 sm:$0xff]  }
  0x82   :  { %1786 = vmatpush1.bf16.msra.mxu1 %v3132_v60  ;;  %1664 = vmatprep.subr.bf16.mxu0 %v3133_v61  ;;  %v3213_v60 = vld [vmem:[#allocation5 + $0x188] ss:$16 sps:$4 sm:$0xff]   ;;  %v3218_v61 = vld [vmem:[#allocation5 + $0x384] ss:$16 sps:$4 sm:$0xff]  }
  0x83   :  { %2899 = vmatprep.subr.msk.bf16.mxu1 %vm1623_vm1, %v2896_v62  ;;  %v3221_v62 = vld [vmem:[#allocation5 + $0x1ac] ss:$16 sps:$4 sm:$0xff]  }
  0x85   :  { %1665 = vmatpush1.bf16.msra.mxu0 %v3136_v0  ;;  %v3219_v0 = vld [vmem:[#allocation5 + $0x1a8] ss:$16 sps:$4 sm:$0xff]  }
  0x86   :  { %1788 = vmatpush1.bf16.msra.mxu1 %v1625_v2  ;;  %1666 = vmatprep.subr.bf16.mxu0 %v3138_v3  ;;  %v3227_v2 = vld [vmem:[#allocation5 + $0x1cc] ss:$16 sps:$4 sm:$0xff]   ;;  %v3222_v3 = vld [vmem:[#allocation5 + $0x3a0] ss:$16 sps:$4 sm:$0xff]  }
  0x87   :  { %1800 = vmatprep.subr.bf16.mxu1 %v3142_v4  ;;  %v3225_v4 = vld [vmem:[#allocation5 + $0x1c8] ss:$16 sps:$4 sm:$0xff]  }
  0x89   :  { %1792 = vmatmul.mubr.bf16.vlgmr.msra.gmra.mrb[0].mxu1 %v3760_v6  ;;  %1667 = vmatpush1.bf16.msra.mxu0 %v3143_v7  ;;  %v3233_v7 = vld [vmem:[#allocation5 + $0x1ec] ss:$16 sps:$4 sm:$0xff]  }
  0x8a   :  { %1801 = vmatpush1.bf16.msra.mxu1 %v3140_v5  ;;  %1677 = vmatprep.subr.bf16.mxu0 %v3146_v9  ;;  %v3230_v5 = vld [vmem:[#allocation5 + $0x3c4] ss:$16 sps:$4 sm:$0xff]   ;;  %v3231_v9 = vld [vmem:[#allocation5 + $0x1e8] ss:$16 sps:$4 sm:$0xff]  }
  0x8b   :  { %1802 = vmatprep.subr.bf16.mxu1 %v3149_v10  ;;  %1832 = vmatprep.mubr.bf16.mxu1 %v90_v50  ;;  %v3203_v50 = vld [vmem:[#allocation5 + $0x14c] ss:$16 sps:$4 sm:$0xff]   ;;  %v3236_v10 = vld [vmem:[#allocation5 + $0x3e4] ss:$16 sps:$4 sm:$0xff]  }
  0x8c   :  { %1669 = vmatmul.mubr.bf16.vlgmr.msra.gmra.mrb[0].mxu0 %v3763_v12 }
  0x8d   :  { %1678 = vmatpush1.bf16.msra.mxu0 %v3144_v11  ;;  %1709 = vmatprep.mubr.bf16.mxu0 %v3766_v37  ;;  %v3239_v11 = vld [vmem:[#allocation5 + $0x20c] ss:$16 sps:$4 sm:$0xff]  }
  0x8e   :  { %1803 = vmatpush1.bf16.msra.mxu1 %v3147_v13  ;;  %1679 = vmatprep.subr.bf16.mxu0 %v3152_v14  ;;  %v3234_v13 = vld [vmem:[#allocation5 + $0x3e0] ss:$16 sps:$4 sm:$0xff]   ;;  %v3237_v14 = vld [vmem:[#allocation5 + $0x208] ss:$16 sps:$4 sm:$0xff]  }
  0x8f   :  { %1804 = vmatprep.subr.bf16.mxu1 %v3155_v15  ;;  %v3242_v15 = vld [vmem:[#allocation5 + $0x404] ss:$16 sps:$4 sm:$0xff]  }
  0x91   :  { %1680 = vmatpush1.bf16.msra.mxu0 %v3150_v16  ;;  %v83_v16 = vld [vmem:[#allocation2 + $0x10] sm:$0xff] }
  0x92   :  { %1805 = vmatpush1.bf16.msra.mxu1 %v3153_v17  ;;  %1681 = vmatprep.subr.bf16.mxu0 %v3158_v18  ;;  %v3245_v17 = vld [vmem:[#allocation5 + $0x22c] ss:$16 sps:$4 sm:$0xff]   ;;  %v3240_v18 = vld [vmem:[#allocation5 + $0x400] ss:$16 sps:$4 sm:$0xff]  }
  0x93   :  { %1806 = vmatprep.subr.bf16.mxu1 %v3161_v19  ;;  %v3770_v19 = vpack.c.bf16 %v83_v16, %v83_v16  ;;  %v3327_v16 = vld [vmem:[#allocation5 + $0x3e8] ss:$16 sps:$4 sm:$0xff]  }
  0x95   :  { %1682 = vmatpush1.bf16.msra.mxu0 %v3156_v20  ;;  %v3243_v20 = vld [vmem:[#allocation5 + $0x228] ss:$16 sps:$4 sm:$0xff]  }
  0x96   :  { %1807 = vmatpush1.bf16.msra.mxu1 %v3159_v21  ;;  %1683 = vmatprep.subr.bf16.mxu0 %v3164_v22  ;;  %v3248_v21 = vld [vmem:[#allocation5 + $0x424] ss:$16 sps:$4 sm:$0xff]   ;;  %v3251_v22 = vld [vmem:[#allocation5 + $0x24c] ss:$16 sps:$4 sm:$0xff]  }
  0x97   :  { %1808 = vmatprep.subr.bf16.mxu1 %v3167_v23  ;;  %v86_v23 = vld [vmem:[#allocation2 + $0x28] sm:$0xff] }
  0x99   :  { %1684 = vmatpush1.bf16.msra.mxu0 %v3162_v24  ;;  %v3773_v24 = vpack.c.bf16 %v86_v23, %v86_v23  ;;  %v3338_v23 = vld [vmem:[#allocation5 + $0x42c] ss:$16 sps:$4 sm:$0xff]  }
  0x9a   :  { %1809 = vmatpush1.bf16.msra.mxu1 %v3165_v25  ;;  %1685 = vmatprep.subr.bf16.mxu0 %v3170_v26  ;;  %v3246_v25 = vld [vmem:[#allocation5 + $0x420] ss:$16 sps:$4 sm:$0xff]   ;;  %v3254_v26 = vld [vmem:[#allocation5 + $0x444] ss:$16 sps:$4 sm:$0xff]  }
  0x9b   :  { %1810 = vmatprep.subr.bf16.mxu1 %v3173_v27  ;;  %v3257_v27 = vld [vmem:[#allocation5 + $0x26c] ss:$16 sps:$4 sm:$0xff]  }
  0x9d   :  { %1686 = vmatpush1.bf16.msra.mxu0 %v3168_v28  ;;  %v3252_v28 = vld [vmem:[#allocation5 + $0x440] ss:$16 sps:$4 sm:$0xff]  }
  0x9e   :  { %1811 = vmatpush1.bf16.msra.mxu1 %v3171_v29  ;;  %1687 = vmatprep.subr.bf16.mxu0 %v3176_v30  ;;  %v3255_v29 = vld [vmem:[#allocation5 + $0x268] ss:$16 sps:$4 sm:$0xff]   ;;  %v3260_v30 = vld [vmem:[#allocation5 + $0x464] ss:$16 sps:$4 sm:$0xff]  }
  0x9f   :  { %1812 = vmatprep.subr.bf16.mxu1 %v3179_v31  ;;  %v3263_v31 = vld [vmem:[#allocation5 + $0x28c] ss:$16 sps:$4 sm:$0xff]  }
  0xa1   :  { %1688 = vmatpush1.bf16.msra.mxu0 %v3174_v32  ;;  %v3258_v32 = vld [vmem:[#allocation5 + $0x460] ss:$16 sps:$4 sm:$0xff]  }
  0xa2   :  { %1813 = vmatpush1.bf16.msra.mxu1 %v3177_v33  ;;  %1689 = vmatprep.subr.bf16.mxu0 %v3182_v34  ;;  %v3261_v33 = vld [vmem:[#allocation5 + $0x288] ss:$16 sps:$4 sm:$0xff]   ;;  %v3266_v34 = vld [vmem:[#allocation5 + $0x484] ss:$16 sps:$4 sm:$0xff]  }
  0xa3   :  { %1814 = vmatprep.subr.bf16.mxu1 %v3185_v35  ;;  %v3269_v35 = vld [vmem:[#allocation5 + $0x2ac] ss:$16 sps:$4 sm:$0xff]  }
  0xa5   :  { %1690 = vmatpush1.bf16.msra.mxu0 %v3180_v38  ;;  %v3272_v38 = vld [vmem:[#allocation5 + $0x4a4] ss:$16 sps:$4 sm:$0xff]  }
  0xa6   :  { %1815 = vmatpush1.bf16.msra.mxu1 %v3183_v39  ;;  %1691 = vmatprep.subr.bf16.mxu0 %v3188_v40  ;;  %v3275_v39 = vld [vmem:[#allocation5 + $0x2cc] ss:$16 sps:$4 sm:$0xff]   ;;  %v3270_v40 = vld [vmem:[#allocation5 + $0x4a0] ss:$16 sps:$4 sm:$0xff]  }
  0xa7   :  { %1816 = vmatprep.subr.bf16.mxu1 %v3191_v41  ;;  %v3273_v41 = vld [vmem:[#allocation5 + $0x2c8] ss:$16 sps:$4 sm:$0xff]  }
  0xa9   :  { %1692 = vmatpush1.bf16.msra.mxu0 %v3186_v42  ;;  %v3278_v42 = vld [vmem:[#allocation5 + $0x4c4] ss:$16 sps:$4 sm:$0xff]  }
  0xaa   :  { %1817 = vmatpush1.bf16.msra.mxu1 %v3189_v43  ;;  %1693 = vmatprep.subr.bf16.mxu0 %v3194_v44  ;;  %v3281_v43 = vld [vmem:[#allocation5 + $0x2ec] ss:$16 sps:$4 sm:$0xff]   ;;  %v3276_v44 = vld [vmem:[#allocation5 + $0x4c0] ss:$16 sps:$4 sm:$0xff]  }
  0xab   :  { %1818 = vmatprep.subr.bf16.mxu1 %v3197_v46  ;;  %v3279_v46 = vld [vmem:[#allocation5 + $0x2e8] ss:$16 sps:$4 sm:$0xff]  }
  0xad   :  { %1694 = vmatpush1.bf16.msra.mxu0 %v3192_v47  ;;  %v3284_v47 = vld [vmem:[#allocation5 + $0x4e4] ss:$16 sps:$4 sm:$0xff]  }
  0xae   :  { %1819 = vmatpush1.bf16.msra.mxu1 %v3195_v48  ;;  %1695 = vmatprep.subr.bf16.mxu0 %v3200_v49  ;;  %v3287_v48 = vld [vmem:[#allocation5 + $0x30c] ss:$16 sps:$4 sm:$0xff]   ;;  %v3282_v49 = vld [vmem:[#allocation5 + $0x4e0] ss:$16 sps:$4 sm:$0xff]  }
  0xaf   :  { %1820 = vmatprep.subr.bf16.mxu1 %v3203_v50  ;;  %v3285_v50 = vld [vmem:[#allocation5 + $0x308] ss:$16 sps:$4 sm:$0xff]  }
  0xb1   :  { %1696 = vmatpush1.bf16.msra.mxu0 %v3198_v51  ;;  %v3290_v51 = vld [vmem:[#allocation5 + $0x504] ss:$16 sps:$4 sm:$0xff]  }
  0xb2   :  { %1821 = vmatpush1.bf16.msra.mxu1 %v3201_v52  ;;  %1697 = vmatprep.subr.bf16.mxu0 %v3206_v53  ;;  %v3293_v52 = vld [vmem:[#allocation5 + $0x32c] ss:$16 sps:$4 sm:$0xff]   ;;  %v3288_v53 = vld [vmem:[#allocation5 + $0x500] ss:$16 sps:$4 sm:$0xff]  }
  0xb3   :  { %1822 = vmatprep.subr.bf16.mxu1 %v3209_v54  ;;  %v3291_v54 = vld [vmem:[#allocation5 + $0x328] ss:$16 sps:$4 sm:$0xff]  }
  0xb5   :  { %1698 = vmatpush1.bf16.msra.mxu0 %v3204_v55  ;;  %v3296_v55 = vld [vmem:[#allocation5 + $0x524] ss:$16 sps:$4 sm:$0xff]  }
  0xb6   :  { %1823 = vmatpush1.bf16.msra.mxu1 %v3207_v56  ;;  %1699 = vmatprep.subr.bf16.mxu0 %v3212_v57  ;;  %v3299_v56 = vld [vmem:[#allocation5 + $0x34c] ss:$16 sps:$4 sm:$0xff]   ;;  %v3294_v57 = vld [vmem:[#allocation5 + $0x520] ss:$16 sps:$4 sm:$0xff]  }
  0xb7   :  { %1824 = vmatprep.subr.bf16.mxu1 %v3215_v58  ;;  %v3297_v58 = vld [vmem:[#allocation5 + $0x348] ss:$16 sps:$4 sm:$0xff]  }
  0xb9   :  { %1700 = vmatpush1.bf16.msra.mxu0 %v3210_v59  ;;  %v3302_v59 = vld [vmem:[#allocation5 + $0x544] ss:$16 sps:$4 sm:$0xff]  }
  0xba   :  { %1825 = vmatpush1.bf16.msra.mxu1 %v3213_v60  ;;  %1701 = vmatprep.subr.bf16.mxu0 %v3218_v61  ;;  %v3305_v60 = vld [vmem:[#allocation5 + $0x36c] ss:$16 sps:$4 sm:$0xff]   ;;  %v3300_v61 = vld [vmem:[#allocation5 + $0x540] ss:$16 sps:$4 sm:$0xff]  }
  0xbb   :  { %1826 = vmatprep.subr.bf16.mxu1 %v3221_v62  ;;  %v3303_v62 = vld [vmem:[#allocation5 + $0x368] ss:$16 sps:$4 sm:$0xff]  }
  0xbd   :  { %1702 = vmatpush1.bf16.msra.mxu0 %v3216_v63  ;;  %v3308_v63 = vld [vmem:[#allocation5 + $0x564] ss:$16 sps:$4 sm:$0xff]  }
  0xbe   :  { %1827 = vmatpush1.bf16.msra.mxu1 %v3219_v0  ;;  %1703 = vmatprep.subr.bf16.mxu0 %v3224_v1  ;;  %v3311_v0 = vld [vmem:[#allocation5 + $0x38c] ss:$16 sps:$4 sm:$0xff]   ;;  %v3306_v1 = vld [vmem:[#allocation5 + $0x560] ss:$16 sps:$4 sm:$0xff]  }
  0xbf   :  { %1828 = vmatprep.subr.bf16.mxu1 %v3227_v2  ;;  %v3309_v2 = vld [vmem:[#allocation5 + $0x388] ss:$16 sps:$4 sm:$0xff]  }
  0xc1   :  { %1704 = vmatpush1.bf16.msra.mxu0 %v3222_v3  ;;  %v3314_v3 = vld [vmem:[#allocation5 + $0x584] ss:$16 sps:$4 sm:$0xff]  }
  0xc2   :  { %1829 = vmatpush1.bf16.msra.mxu1 %v3225_v4  ;;  %1705 = vmatprep.subr.bf16.mxu0 %v3230_v5  ;;  %v3317_v4 = vld [vmem:[#allocation5 + $0x3ac] ss:$16 sps:$4 sm:$0xff]   ;;  %v3312_v5 = vld [vmem:[#allocation5 + $0x580] ss:$16 sps:$4 sm:$0xff]  }
  0xc3   :  { %1830 = vmatprep.subr.bf16.mxu1 %v3233_v7  ;;  %v3315_v7 = vld [vmem:[#allocation5 + $0x3a8] ss:$16 sps:$4 sm:$0xff]  }
  0xc5   :  { %1706 = vmatpush1.bf16.msra.mxu0 %v3228_v8  ;;  %v3320_v8 = vld [vmem:[#allocation5 + $0x5a4] ss:$16 sps:$4 sm:$0xff]  }
  0xc6   :  { %1831 = vmatpush1.bf16.msra.mxu1 %v3231_v9  ;;  %1707 = vmatprep.subr.bf16.mxu0 %v3236_v10  ;;  %v3323_v9 = vld [vmem:[#allocation5 + $0x3cc] ss:$16 sps:$4 sm:$0xff]   ;;  %v3318_v10 = vld [vmem:[#allocation5 + $0x5a0] ss:$16 sps:$4 sm:$0xff]  }
  0xc7   :  { %1841 = vmatprep.subr.bf16.mxu1 %v3239_v11  ;;  %v3321_v11 = vld [vmem:[#allocation5 + $0x3c8] ss:$16 sps:$4 sm:$0xff]  }
  0xc9   :  { %1833 = vmatmul.mubr.bf16.vlgmr.msra.gmra.mrb[4].mxu1 %v3763_v12  ;;  %1708 = vmatpush1.bf16.msra.mxu0 %v3234_v13  ;;  %v3249_v12 = vld [vmem:[#allocation5 + $0x248] ss:$16 sps:$4 sm:$0xff]   ;;  %v3326_v13 = vld [vmem:[#allocation5 + $0x5c4] ss:$16 sps:$4 sm:$0xff]  }
  0xca   :  { %1842 = vmatpush1.bf16.msra.mxu1 %v3237_v14  ;;  %1718 = vmatprep.subr.bf16.mxu0 %v3242_v15  ;;  %v3329_v14 = vld [vmem:[#allocation5 + $0x3ec] ss:$16 sps:$4 sm:$0xff]   ;;  %v3324_v15 = vld [vmem:[#allocation5 + $0x5c0] ss:$16 sps:$4 sm:$0xff]  }
  0xcb   :  { %1843 = vmatprep.subr.bf16.mxu1 %v3245_v17  ;;  %1873 = vmatprep.mubr.bf16.mxu1 %v3766_v37  ;;  %v3267_v37 = vld [vmem:[#allocation5 + $0x2a8] ss:$16 sps:$4 sm:$0xff]   ;;  %v3332_v17 = vld [vmem:[#allocation5 + $0x5e4] ss:$16 sps:$4 sm:$0xff]  }
  0xcc   :  { %1710 = vmatmul.mubr.bf16.vlgmr.msra.gmra.mrb[0].mxu0 %v3770_v19 }
  0xcd   :  { %1719 = vmatpush1.bf16.msra.mxu0 %v3240_v18  ;;  %1750 = vmatprep.mubr.bf16.mxu0 %v3773_v24  ;;  %v3335_v18 = vld [vmem:[#allocation5 + $0x40c] ss:$16 sps:$4 sm:$0xff]  }
  0xce   :  { %1844 = vmatpush1.bf16.msra.mxu1 %v3243_v20  ;;  %1720 = vmatprep.subr.bf16.mxu0 %v3248_v21  ;;  %v3330_v20 = vld [vmem:[#allocation5 + $0x5e0] ss:$16 sps:$4 sm:$0xff]   ;;  %v3333_v21 = vld [vmem:[#allocation5 + $0x408] ss:$16 sps:$4 sm:$0xff]  }
  0xcf   :  { %1845 = vmatprep.subr.bf16.mxu1 %v3251_v22  ;;  %v85_v22 = vld [vmem:[#allocation2 + $0x20] sm:$0xff] }
  0xd1   :  { %1721 = vmatpush1.bf16.msra.mxu0 %v3246_v25  ;;  %v3427_v25 = vld [vmem:[#allocation7 + $0x4] ss:$8 sps:$4 sm:$0xff]  }
  0xd2   :  { %1846 = vmatpush1.bf16.msra.mxu1 %v3249_v12  ;;  %1722 = vmatprep.subr.bf16.mxu0 %v3254_v26  ;;  %v3778_v12 = vpack.c.bf16 %v85_v22, %v85_v22  ;;  %v3336_v26 = vld [vmem:[#allocation5 + $0x428] ss:$16 sps:$4 sm:$0xff]   ;;  %v3386_v22 = vld [vmem:[#allocation5 + $0x62c] ss:$16 sps:$4 sm:$0xff]  }
  0xd3   :  { %1847 = vmatprep.subr.bf16.mxu1 %v3257_v27  ;;  %v3425_v27 = vld [vmem:[#allocation7] ss:$8 sps:$4 sm:$0xff]  }
  0xd5   :  { %1723 = vmatpush1.bf16.msra.mxu0 %v3252_v28  ;;  %v3341_v28 = vld [vmem:[#allocation5 + $0x44c] ss:$16 sps:$4 sm:$0xff]  }
  0xd6   :  { %1848 = vmatpush1.bf16.msra.mxu1 %v3255_v29  ;;  %1724 = vmatprep.subr.bf16.mxu0 %v3260_v30  ;;  %v3430_v29 = vld [vmem:[#allocation7 + $0x14] ss:$8 sps:$4 sm:$0xff]   ;;  %v3339_v30 = vld [vmem:[#allocation5 + $0x448] ss:$16 sps:$4 sm:$0xff]  }
  0xd7   :  { %1849 = vmatprep.subr.bf16.mxu1 %v3263_v31  ;;  %v3344_v31 = vld [vmem:[#allocation5 + $0x46c] ss:$16 sps:$4 sm:$0xff]  }
  0xd9   :  { %1725 = vmatpush1.bf16.msra.mxu0 %v3258_v32  ;;  %v3428_v32 = vld [vmem:[#allocation7 + $0x10] ss:$8 sps:$4 sm:$0xff]  }
  0xda   :  { %1850 = vmatpush1.bf16.msra.mxu1 %v3261_v33  ;;  %1726 = vmatprep.subr.bf16.mxu0 %v3266_v34  ;;  %v3342_v33 = vld [vmem:[#allocation5 + $0x468] ss:$16 sps:$4 sm:$0xff]  }
  0xdb   :  { %1851 = vmatprep.subr.bf16.mxu1 %v3269_v35  ;;  %v3431_v34 = vld [vmem:[#allocation7 + $0x20] ss:$8 sps:$4 sm:$0xff]   ;;  %v3347_v35 = vld [vmem:[#allocation5 + $0x48c] ss:$16 sps:$4 sm:$0xff]  }
  0xdd   :  { %1727 = vmatpush1.bf16.msra.mxu0 %v3264_v36  ;;  %v3436_v36 = vld [vmem:[#allocation7 + $0x34] ss:$8 sps:$4 sm:$0xff]  }
  0xde   :  { %1852 = vmatpush1.bf16.msra.mxu1 %v3267_v37  ;;  %1728 = vmatprep.subr.bf16.mxu0 %v3272_v38  ;;  %v3434_v37 = vld [vmem:[#allocation7 + $0x30] ss:$8 sps:$4 sm:$0xff]   ;;  %v3350_v38 = vld [vmem:[#allocation5 + $0x4ac] ss:$16 sps:$4 sm:$0xff]  }
  0xdf   :  { %1853 = vmatprep.subr.bf16.mxu1 %v3275_v39  ;;  %v3439_v39 = vld [vmem:[#allocation7 + $0x44] ss:$8 sps:$4 sm:$0xff]  }
  0xe1   :  { %1729 = vmatpush1.bf16.msra.mxu0 %v3270_v40  ;;  %v3348_v40 = vld [vmem:[#allocation5 + $0x4a8] ss:$16 sps:$4 sm:$0xff]  }
  0xe2   :  { %1854 = vmatpush1.bf16.msra.mxu1 %v3273_v41  ;;  %1730 = vmatprep.subr.bf16.mxu0 %v3278_v42  ;;  %v3437_v41 = vld [vmem:[#allocation7 + $0x40] ss:$8 sps:$4 sm:$0xff]   ;;  %v3353_v42 = vld [vmem:[#allocation5 + $0x4cc] ss:$16 sps:$4 sm:$0xff]  }
  0xe3   :  { %1855 = vmatprep.subr.bf16.mxu1 %v3281_v43  ;;  %v3442_v43 = vld [vmem:[#allocation7 + $0x54] ss:$8 sps:$4 sm:$0xff]  }
  0xe5   :  { %1731 = vmatpush1.bf16.msra.mxu0 %v3276_v44  ;;  %v3351_v44 = vld [vmem:[#allocation5 + $0x4c8] ss:$16 sps:$4 sm:$0xff]  }
  0xe6   :  { %1856 = vmatpush1.bf16.msra.mxu1 %v3279_v46  ;;  %1732 = vmatprep.subr.bf16.mxu0 %v3284_v47  ;;  %v3440_v46 = vld [vmem:[#allocation7 + $0x50] ss:$8 sps:$4 sm:$0xff]   ;;  %v3356_v47 = vld [vmem:[#allocation5 + $0x4ec] ss:$16 sps:$4 sm:$0xff]  }
  0xe7   :  { %1857 = vmatprep.subr.bf16.mxu1 %v3287_v48  ;;  %v3445_v48 = vld [vmem:[#allocation7 + $0x64] ss:$8 sps:$4 sm:$0xff]  }
  0xe9   :  { %1733 = vmatpush1.bf16.msra.mxu0 %v3282_v49  ;;  %v3354_v49 = vld [vmem:[#allocation5 + $0x4e8] ss:$16 sps:$4 sm:$0xff]  }
  0xea   :  { %1858 = vmatpush1.bf16.msra.mxu1 %v3285_v50  ;;  %1734 = vmatprep.subr.bf16.mxu0 %v3290_v51  ;;  %v3443_v50 = vld [vmem:[#allocation7 + $0x60] ss:$8 sps:$4 sm:$0xff]   ;;  %v3359_v51 = vld [vmem:[#allocation5 + $0x50c] ss:$16 sps:$4 sm:$0xff]  }
  0xeb   :  { %1859 = vmatprep.subr.bf16.mxu1 %v3293_v52  ;;  %v3448_v52 = vld [vmem:[#allocation7 + $0x74] ss:$8 sps:$4 sm:$0xff]  }
  0xed   :  { %1735 = vmatpush1.bf16.msra.mxu0 %v3288_v53  ;;  %v3357_v53 = vld [vmem:[#allocation5 + $0x508] ss:$16 sps:$4 sm:$0xff]  }
  0xee   :  { %1860 = vmatpush1.bf16.msra.mxu1 %v3291_v54  ;;  %1736 = vmatprep.subr.bf16.mxu0 %v3296_v55  ;;  %v3446_v54 = vld [vmem:[#allocation7 + $0x70] ss:$8 sps:$4 sm:$0xff]   ;;  %v3362_v55 = vld [vmem:[#allocation5 + $0x52c] ss:$16 sps:$4 sm:$0xff]  }
  0xef   :  { %1861 = vmatprep.subr.bf16.mxu1 %v3299_v56  ;;  %v3451_v56 = vld [vmem:[#allocation7 + $0x84] ss:$8 sps:$4 sm:$0xff]  }
  0xf1   :  { %1737 = vmatpush1.bf16.msra.mxu0 %v3294_v57  ;;  %v3360_v57 = vld [vmem:[#allocation5 + $0x528] ss:$16 sps:$4 sm:$0xff]  }
  0xf2   :  { %1862 = vmatpush1.bf16.msra.mxu1 %v3297_v58  ;;  %1738 = vmatprep.subr.bf16.mxu0 %v3302_v59  ;;  %v3449_v58 = vld [vmem:[#allocation7 + $0x80] ss:$8 sps:$4 sm:$0xff]   ;;  %v3365_v59 = vld [vmem:[#allocation5 + $0x54c] ss:$16 sps:$4 sm:$0xff]  }
  0xf3   :  { %1863 = vmatprep.subr.bf16.mxu1 %v3305_v60  ;;  %v3454_v60 = vld [vmem:[#allocation7 + $0x94] ss:$8 sps:$4 sm:$0xff]  }
  0xf5   :  { %1739 = vmatpush1.bf16.msra.mxu0 %v3300_v61  ;;  %v3363_v61 = vld [vmem:[#allocation5 + $0x548] ss:$16 sps:$4 sm:$0xff]  }
  0xf6   :  { %1864 = vmatpush1.bf16.msra.mxu1 %v3303_v62  ;;  %1740 = vmatprep.subr.bf16.mxu0 %v3308_v63  ;;  %v3452_v62 = vld [vmem:[#allocation7 + $0x90] ss:$8 sps:$4 sm:$0xff]   ;;  %v3368_v63 = vld [vmem:[#allocation5 + $0x56c] ss:$16 sps:$4 sm:$0xff]  }
  0xf7   :  { %1865 = vmatprep.subr.bf16.mxu1 %v3311_v0  ;;  %v3457_v0 = vld [vmem:[#allocation7 + $0xa4] ss:$8 sps:$4 sm:$0xff]  }
  0xf9   :  { %1741 = vmatpush1.bf16.msra.mxu0 %v3306_v1  ;;  %v3366_v1 = vld [vmem:[#allocation5 + $0x568] ss:$16 sps:$4 sm:$0xff]  }
  0xfa   :  { %1866 = vmatpush1.bf16.msra.mxu1 %v3309_v2  ;;  %1742 = vmatprep.subr.bf16.mxu0 %v3314_v3  ;;  %v3455_v2 = vld [vmem:[#allocation7 + $0xa0] ss:$8 sps:$4 sm:$0xff]   ;;  %v3371_v3 = vld [vmem:[#allocation5 + $0x58c] ss:$16 sps:$4 sm:$0xff]  }
  0xfb   :  { %1867 = vmatprep.subr.bf16.mxu1 %v3317_v4  ;;  %v3460_v4 = vld [vmem:[#allocation7 + $0xb4] ss:$8 sps:$4 sm:$0xff]  }
  0xfd   :  { %1743 = vmatpush1.bf16.msra.mxu0 %v3312_v5  ;;  %v3369_v5 = vld [vmem:[#allocation5 + $0x588] ss:$16 sps:$4 sm:$0xff]  }
  0xfe   :  { %1868 = vmatpush1.bf16.msra.mxu1 %v3315_v7  ;;  %1744 = vmatprep.subr.bf16.mxu0 %v3320_v8  ;;  %v3458_v7 = vld [vmem:[#allocation7 + $0xb0] ss:$8 sps:$4 sm:$0xff]   ;;  %v3374_v8 = vld [vmem:[#allocation5 + $0x5ac] ss:$16 sps:$4 sm:$0xff]  }
  0xff   :  { %1869 = vmatprep.subr.bf16.mxu1 %v3323_v9  ;;  %v3463_v9 = vld [vmem:[#allocation7 + $0xc4] ss:$8 sps:$4 sm:$0xff]  }
 0x101   :  { %1745 = vmatpush1.bf16.msra.mxu0 %v3318_v10  ;;  %v3372_v10 = vld [vmem:[#allocation5 + $0x5a8] ss:$16 sps:$4 sm:$0xff]  }
 0x102   :  { %1870 = vmatpush1.bf16.msra.mxu1 %v3321_v11  ;;  %1746 = vmatprep.subr.bf16.mxu0 %v3326_v13  ;;  %v3461_v11 = vld [vmem:[#allocation7 + $0xc0] ss:$8 sps:$4 sm:$0xff]   ;;  %v3377_v13 = vld [vmem:[#allocation5 + $0x5cc] ss:$16 sps:$4 sm:$0xff]  }
 0x103   :  { %1871 = vmatprep.subr.bf16.mxu1 %v3329_v14  ;;  %v3466_v14 = vld [vmem:[#allocation7 + $0xd4] ss:$8 sps:$4 sm:$0xff]  }
 0x105   :  { %1747 = vmatpush1.bf16.msra.mxu0 %v3324_v15  ;;  %v3375_v15 = vld [vmem:[#allocation5 + $0x5c8] ss:$16 sps:$4 sm:$0xff]  }
 0x106   :  { %1872 = vmatpush1.bf16.msra.mxu1 %v3327_v16  ;;  %1748 = vmatprep.subr.bf16.mxu0 %v3332_v17  ;;  %v3464_v16 = vld [vmem:[#allocation7 + $0xd0] ss:$8 sps:$4 sm:$0xff]   ;;  %v3380_v17 = vld [vmem:[#allocation5 + $0x5ec] ss:$16 sps:$4 sm:$0xff]  }
 0x107   :  { %1882 = vmatprep.subr.bf16.mxu1 %v3335_v18  ;;  %v3378_v18 = vld [vmem:[#allocation5 + $0x5e8] ss:$16 sps:$4 sm:$0xff]  }
 0x109   :  { %1874 = vmatmul.mubr.bf16.vlgmr.msra.gmra.mrb[4].mxu1 %v3770_v19  ;;  %1749 = vmatpush1.bf16.msra.mxu0 %v3330_v20  ;;  %v3433_v19 = vld [vmem:[#allocation7 + $0x24] ss:$8 sps:$4 sm:$0xff]  }
 0x10a   :  { %1883 = vmatpush1.bf16.msra.mxu1 %v3333_v21  ;;  %1914 = vmatprep.mubr.bf16.mxu1 %v3773_v24  ;;  %v3345_v24 = vld [vmem:[#allocation5 + $0x488] ss:$16 sps:$4 sm:$0xff]   ;;  %v3383_v20 = vld [vmem:[#allocation5 + $0x60c] ss:$16 sps:$4 sm:$0xff]  }
 0x10b   :  { %1884 = vmatprep.subr.bf16.mxu1 %v3338_v23  ;;  %2368 = vmatprep.subr.bf16.mxu0 %v3427_v25  ;;  %v3381_v21 = vld [vmem:[#allocation5 + $0x608] ss:$16 sps:$4 sm:$0xff]   ;;  %v3389_v25 = vld [vmem:[#allocation5 + $0x64c] ss:$16 sps:$4 sm:$0xff]  }
 0x10c   :  { %1751 = vmatmul.mubr.bf16.vlgmr.msra.gmra.mrb[0].mxu0 %v3778_v12  ;;  %v3384_v23 = vld [vmem:[#allocation5 + $0x628] ss:$16 sps:$4 sm:$0xff]  }
 0x10d   :  { %2369 = vmatpush1.bf16.msra.mxu0 %v3425_v27  ;;  %v3392_v27 = vld [vmem:[#allocation5 + $0x66c] ss:$16 sps:$4 sm:$0xff]  }
 0x10e   :  { %1885 = vmatpush1.bf16.msra.mxu1 %v3336_v26  ;;  %2370 = vmatprep.subr.bf16.mxu0 %v3430_v29  ;;  %v3387_v26 = vld [vmem:[#allocation5 + $0x648] ss:$16 sps:$4 sm:$0xff]   ;;  %v3395_v29 = vld [vmem:[#allocation5 + $0x68c] ss:$16 sps:$4 sm:$0xff]  }
 0x10f   :  { %1886 = vmatprep.subr.bf16.mxu1 %v3341_v28  ;;  %v3390_v28 = vld [vmem:[#allocation5 + $0x668] ss:$16 sps:$4 sm:$0xff]  }
 0x111   :  { %2371 = vmatpush1.bf16.msra.mxu0 %v3428_v32  ;;  %v3401_v32 = vld [vmem:[#allocation5 + $0x6cc] ss:$16 sps:$4 sm:$0xff]  }
 0x112   :  { %1887 = vmatpush1.bf16.msra.mxu1 %v3339_v30  ;;  %2372 = vmatprep.subr.bf16.mxu0 %v3433_v19  ;;  %v3393_v30 = vld [vmem:[#allocation5 + $0x688] ss:$16 sps:$4 sm:$0xff]  }
 0x113   :  { %1888 = vmatprep.subr.bf16.mxu1 %v3344_v31  ;;  %v3398_v31 = vld [vmem:[#allocation5 + $0x6ac] ss:$16 sps:$4 sm:$0xff]  }
 0x115   :  { %2373 = vmatpush1.bf16.msra.mxu0 %v3431_v34  ;;  %v3399_v34 = vld [vmem:[#allocation5 + $0x6c8] ss:$16 sps:$4 sm:$0xff]  }
 0x116   :  { %1889 = vmatpush1.bf16.msra.mxu1 %v3342_v33  ;;  %2374 = vmatprep.subr.bf16.mxu0 %v3436_v36  ;;  %v3404_v36 = vld [vmem:[#allocation5 + $0x6ec] ss:$16 sps:$4 sm:$0xff]  }
 0x117   :  { %1890 = vmatprep.subr.bf16.mxu1 %v3347_v35 }
 0x119   :  { %2375 = vmatpush1.bf16.msra.mxu0 %v3434_v37  ;;  %v3402_v37 = vld [vmem:[#allocation5 + $0x6e8] ss:$16 sps:$4 sm:$0xff]  }
 0x11a   :  { %1891 = vmatpush1.bf16.msra.mxu1 %v3345_v24  ;;  %2376 = vmatprep.subr.bf16.mxu0 %v3439_v39  ;;  %v3469_v24 = vld [vmem:[#allocation7 + $0xe4] ss:$8 sps:$4 sm:$0xff]  }
 0x11b   :  { %1892 = vmatprep.subr.bf16.mxu1 %v3350_v38  ;;  %v3467_v38 = vld [vmem:[#allocation7 + $0xe0] ss:$8 sps:$4 sm:$0xff]   ;;  %v3407_v39 = vld [vmem:[#allocation5 + $0x70c] ss:$16 sps:$4 sm:$0xff]  }
 0x11d   :  { %2377 = vmatpush1.bf16.msra.mxu0 %v3437_v41  ;;  %v3405_v41 = vld [vmem:[#allocation5 + $0x708] ss:$16 sps:$4 sm:$0xff]  }
 0x11e   :  { %1893 = vmatpush1.bf16.msra.mxu1 %v3348_v40  ;;  %2378 = vmatprep.subr.bf16.mxu0 %v3442_v43  ;;  %v3472_v40 = vld [vmem:[#allocation7 + $0xf4] ss:$8 sps:$4 sm:$0xff]  }
 0x11f   :  { %1894 = vmatprep.subr.bf16.mxu1 %v3353_v42  ;;  %v3470_v42 = vld [vmem:[#allocation7 + $0xf0] ss:$8 sps:$4 sm:$0xff]   ;;  %v3410_v43 = vld [vmem:[#allocation5 + $0x72c] ss:$16 sps:$4 sm:$0xff]  }
 0x121   :  { %2379 = vmatpush1.bf16.msra.mxu0 %v3440_v46  ;;  %v3413_v46 = vld [vmem:[#allocation5 + $0x74c] ss:$16 sps:$4 sm:$0xff]  }
 0x122   :  { %1895 = vmatpush1.bf16.msra.mxu1 %v3351_v44  ;;  %2380 = vmatprep.subr.bf16.mxu0 %v3445_v48  ;;  %v3408_v44 = vld [vmem:[#allocation5 + $0x728] ss:$16 sps:$4 sm:$0xff]  }
 0x123   :  { %1896 = vmatprep.subr.bf16.mxu1 %v3356_v47  ;;  %v3475_v47 = vld [vmem:[#allocation7 + $0x104] ss:$8 sps:$4 sm:$0xff]   ;;  %v3411_v48 = vld [vmem:[#allocation5 + $0x748] ss:$16 sps:$4 sm:$0xff]  }
 0x125   :  { %2381 = vmatpush1.bf16.msra.mxu0 %v3443_v50  ;;  %v3414_v50 = vld [vmem:[#allocation5 + $0x768] ss:$16 sps:$4 sm:$0xff]  }
 0x126   :  { %1897 = vmatpush1.bf16.msra.mxu1 %v3354_v49  ;;  %2382 = vmatprep.subr.bf16.mxu0 %v3448_v52  ;;  %v3416_v49 = vld [vmem:[#allocation5 + $0x76c] ss:$16 sps:$4 sm:$0xff]   ;;  %v3417_v52 = vld [vmem:[#allocation5 + $0x788] ss:$16 sps:$4 sm:$0xff]  }
 0x127   :  { %1898 = vmatprep.subr.bf16.mxu1 %v3359_v51  ;;  %v3419_v51 = vld [vmem:[#allocation5 + $0x78c] ss:$16 sps:$4 sm:$0xff]  }
 0x129   :  { %2383 = vmatpush1.bf16.msra.mxu0 %v3446_v54  ;;  %v346_v54 = vld [vmem:[#allocation5 + $0x7c8] sm:$0xff] }
 0x12a   :  { %1899 = vmatpush1.bf16.msra.mxu1 %v3357_v53  ;;  %2384 = vmatprep.subr.bf16.mxu0 %v3451_v56  ;;  %v3422_v53 = vld [vmem:[#allocation5 + $0x7ac] ss:$16 sps:$4 sm:$0xff]   ;;  %v2898_v56 = vcombine.high %v346_v54, %v346_v54 }
 0x12b   :  { %1900 = vmatprep.subr.bf16.mxu1 %v3362_v55  ;;  %v3420_v55 = vld [vmem:[#allocation5 + $0x7a8] ss:$16 sps:$4 sm:$0xff]  }
 0x12d   :  { %2385 = vmatpush1.bf16.msra.mxu0 %v3449_v58 }
 0x12e   :  { %1901 = vmatpush1.bf16.msra.mxu1 %v3360_v57  ;;  %2386 = vmatprep.subr.bf16.mxu0 %v3454_v60  ;;  %v2897_v57 = vcombine.low %v346_v54, %v346_v54  ;;  %v3515_v54 = vld [vmem:[#allocation7 + $0x1e0] ss:$8 sps:$4 sm:$0xff]  }
 0x12f   :  { %1902 = vmatprep.subr.bf16.mxu1 %v3365_v59  ;;  %v349_v59 = vlaneseq }
 0x130   :  { %v1631_v58 = vsel %vm1623_vm1, %v2897_v57, 0 }
 0x131   :  { %2387 = vmatpush1.bf16.msra.mxu0 %v3452_v62  ;;  %v3792_v60 = vshrl.u32 %v349_v59, 7  ;;  %v3798_v62 = vld [vmem:[%s3837_s2] sm:$0xf] }
 0x132   :  { %1903 = vmatpush1.bf16.msra.mxu1 %v3363_v61  ;;  %2388 = vmatprep.subr.bf16.mxu0 %v3457_v0 }
 0x133   :  { %1904 = vmatprep.subr.bf16.mxu1 %v3368_v63  ;;  %v351_v61 = vsub.s32 0, %v3792_v60  ;;  %v355_v63 = vsub.s32 1, %v3792_v60  ;;  %v359_v57 = vsub.s32 2, %v3792_v60 }
 0x135   :  { %2389 = vmatpush1.bf16.msra.mxu0 %v3455_v2  ;;  %v352_v0 = vrot.slane %v3798_v62, %v351_v61  ;;  %v360_v59 = vrot.slane %v3798_v62, %v359_v57 }
 0x136   :  { %1905 = vmatpush1.bf16.msra.mxu1 %v3366_v1  ;;  %2390 = vmatprep.subr.bf16.mxu0 %v3460_v4  ;;  %v3521_v4 = vld [vmem:[#allocation8 + $0x40] sm:$0xff]  }
 0x137   :  { %1906 = vmatprep.subr.bf16.mxu1 %v3371_v3 }
 0x139   :  { %2391 = vmatpush1.bf16.msra.mxu0 %v3458_v7  ;;  %v3523_v7 = vld [vmem:[#allocation8 + $0x48] sm:$0xff]  }
 0x13a   :  { %1907 = vmatpush1.bf16.msra.mxu1 %v3369_v5  ;;  %2392 = vmatprep.subr.bf16.mxu0 %v3463_v9  ;;  %v3522_v5 = vld [vmem:[#allocation8] sm:$0xff]  }
 0x13b   :  { %1908 = vmatprep.subr.bf16.mxu1 %v3374_v8 }
 0x13d   :  { %2393 = vmatpush1.bf16.msra.mxu0 %v3461_v11 }
 0x13e   :  { %1909 = vmatpush1.bf16.msra.mxu1 %v3372_v10  ;;  %2394 = vmatprep.subr.bf16.mxu0 %v3466_v14  ;;  %v3524_v14 = vld [vmem:[#allocation8 + $0x8] sm:$0xff]  }
 0x13f   :  { %1910 = vmatprep.subr.bf16.mxu1 %v3377_v13 }
 0x141   :  { %2395 = vmatpush1.bf16.msra.mxu0 %v3464_v16  ;;  %v3525_v16 = vld [vmem:[#allocation8 + $0x50] sm:$0xff]  }
 0x142   :  { %1911 = vmatpush1.bf16.msra.mxu1 %v3375_v15  ;;  %2396 = vmatprep.subr.bf16.mxu0 %v3469_v24  ;;  %v3493_v24 = vld [vmem:[#allocation7 + $0x164] ss:$8 sps:$4 sm:$0xff]  }
 0x143   :  { %1912 = vmatprep.subr.bf16.mxu1 %v3380_v17 }
 0x145   :  { %2397 = vmatpush1.bf16.msra.mxu0 %v3467_v38  ;;  %v3496_v38 = vld [vmem:[#allocation7 + $0x174] ss:$8 sps:$4 sm:$0xff]  }
 0x146   :  { %1913 = vmatpush1.bf16.msra.mxu1 %v3378_v18  ;;  %2398 = vmatprep.subr.bf16.mxu0 %v3472_v40  ;;  %v3499_v40 = vld [vmem:[#allocation7 + $0x184] ss:$8 sps:$4 sm:$0xff]  }
 0x147   :  { %1923 = vmatprep.subr.bf16.mxu1 %v3383_v20  ;;  %v3473_v20 = vld [vmem:[#allocation7 + $0x100] ss:$8 sps:$4 sm:$0xff]  }
 0x149   :  { %1915 = vmatmul.mubr.bf16.vlgmr.msra.gmra.mrb[4].mxu1 %v3778_v12  ;;  %v3396_v12 = vld [vmem:[#allocation5 + $0x6a8] ss:$16 sps:$4 sm:$0xff]   ;;  %2399 = vmatpush1.bf16.msra.mxu0 %v3470_v42  ;;  %v3502_v42 = vld [vmem:[#allocation7 + $0x194] ss:$8 sps:$4 sm:$0xff]  }
 0x14a   :  { %1924 = vmatpush1.bf16.msra.mxu1 %v3381_v21  ;;  %2902 = vmatprep.mubr.msk.bf16.mxu1 %vm1619_vm0, %v3754_v45  ;;  %v3526_v21 = vld [vmem:[#allocation8 + $0x10] sm:$0xff]  }
 0x14b   :  { %1925 = vmatprep.subr.bf16.mxu1 %v3386_v22  ;;  %2409 = vmatprep.subr.bf16.mxu0 %v3475_v47  ;;  %v3508_v47 = vld [vmem:[#allocation7 + $0x1b4] ss:$8 sps:$4 sm:$0xff]  }
 0x14e   :  { %1926 = vmatpush1.bf16.msra.mxu1 %v3384_v23  ;;  %v3478_v23 = vld [vmem:[#allocation7 + $0x114] ss:$8 sps:$4 sm:$0xff]  }
 0x14f   :  { %1927 = vmatprep.subr.bf16.mxu1 %v3389_v25  ;;  %v3527_v25 = vld [vmem:[#allocation8 + $0x58] sm:$0xff]  }
 0x152   :  { %1928 = vmatpush1.bf16.msra.mxu1 %v3387_v26  ;;  %v3476_v26 = vld [vmem:[#allocation7 + $0x110] ss:$8 sps:$4 sm:$0xff]  }
 0x153   :  { %1929 = vmatprep.subr.bf16.mxu1 %v3392_v27  ;;  %v3528_v27 = vld [vmem:[#allocation8 + $0x18] sm:$0xff]  }
 0x156   :  { %1930 = vmatpush1.bf16.msra.mxu1 %v3390_v28  ;;  %v3481_v28 = vld [vmem:[#allocation7 + $0x124] ss:$8 sps:$4 sm:$0xff]  }
 0x157   :  { %1931 = vmatprep.subr.bf16.mxu1 %v3395_v29  ;;  %v3529_v29 = vld [vmem:[#allocation8 + $0x60] sm:$0xff]  }
 0x15a   :  { %1932 = vmatpush1.bf16.msra.mxu1 %v3393_v30  ;;  %v3479_v30 = vld [vmem:[#allocation7 + $0x120] ss:$8 sps:$4 sm:$0xff]  }
 0x15b   :  { %1933 = vmatprep.subr.bf16.mxu1 %v3398_v31  ;;  %v3530_v31 = vld [vmem:[#allocation8 + $0x20] sm:$0xff]  }
 0x15c   :  { %v3785_v19 = vpop.f32.mrb[0].mxu1 }
 0x15d   :  { %v3787_v45 = vpop.f32.mrb[1].mxu1 }
 0x15e   :  { %v1797_v33 = vpop.f32.mrb[2].mxu1  ;;  %1934 = vmatpush1.bf16.msra.mxu1 %v3396_v12  ;;  %v3484_v12 = vld [vmem:[#allocation7 + $0x134] ss:$8 sps:$4 sm:$0xff]  }
 0x15f   :  { %v1798_v35 = vpop.f32.mrb[3].mxu1  ;;  %1935 = vmatprep.subr.bf16.mxu1 %v3401_v32  ;;  %v3531_v32 = vld [vmem:[#allocation8 + $0x68] sm:$0xff]  }
 0x160   :  { %v3487_v33 = vld [vmem:[#allocation7 + $0x144] ss:$8 sps:$4 sm:$0xff]   ;;  %v3490_v35 = vld [vmem:[#allocation7 + $0x154] ss:$8 sps:$4 sm:$0xff]  }
 0x162   :  { %1936 = vmatpush1.bf16.msra.mxu1 %v3399_v34  ;;  %v3485_v34 = vld [vmem:[#allocation7 + $0x140] ss:$8 sps:$4 sm:$0xff]  }
 0x163   :  { %1937 = vmatprep.subr.bf16.mxu1 %v3404_v36  ;;  %v3488_v36 = vld [vmem:[#allocation7 + $0x150] ss:$8 sps:$4 sm:$0xff]  }
 0x166   :  { %1938 = vmatpush1.bf16.msra.mxu1 %v3402_v37  ;;  %v3491_v37 = vld [vmem:[#allocation7 + $0x160] ss:$8 sps:$4 sm:$0xff]  }
 0x167   :  { %1939 = vmatprep.subr.bf16.mxu1 %v3407_v39  ;;  %v3494_v39 = vld [vmem:[#allocation7 + $0x170] ss:$8 sps:$4 sm:$0xff]  }
 0x16a   :  { %1940 = vmatpush1.bf16.msra.mxu1 %v3405_v41  ;;  %v3497_v41 = vld [vmem:[#allocation7 + $0x180] ss:$8 sps:$4 sm:$0xff]  }
 0x16b   :  { %1941 = vmatprep.subr.bf16.mxu1 %v3410_v43  ;;  %v3500_v43 = vld [vmem:[#allocation7 + $0x190] ss:$8 sps:$4 sm:$0xff]  }
 0x16e   :  { %1942 = vmatpush1.bf16.msra.mxu1 %v3408_v44  ;;  %v3505_v44 = vld [vmem:[#allocation7 + $0x1a4] ss:$8 sps:$4 sm:$0xff]  }
 0x16f   :  { %1943 = vmatprep.subr.bf16.mxu1 %v3413_v46  ;;  %v3503_v46 = vld [vmem:[#allocation7 + $0x1a0] ss:$8 sps:$4 sm:$0xff]  }
 0x172   :  { %1944 = vmatpush1.bf16.msra.mxu1 %v3411_v48  ;;  %v3506_v48 = vld [vmem:[#allocation7 + $0x1b0] ss:$8 sps:$4 sm:$0xff]  }
 0x173   :  { %1945 = vmatprep.subr.bf16.mxu1 %v3416_v49  ;;  %v3511_v49 = vld [vmem:[#allocation7 + $0x1c4] ss:$8 sps:$4 sm:$0xff]  }
 0x176   :  { %1946 = vmatpush1.bf16.msra.mxu1 %v3414_v50  ;;  %v3509_v50 = vld [vmem:[#allocation7 + $0x1c0] ss:$8 sps:$4 sm:$0xff]  }
 0x177   :  { %1947 = vmatprep.subr.bf16.mxu1 %v3419_v51  ;;  %v3514_v51 = vld [vmem:[#allocation7 + $0x1d4] ss:$8 sps:$4 sm:$0xff]  }
 0x17a   :  { %1948 = vmatpush1.bf16.msra.mxu1 %v3417_v52  ;;  %v3512_v52 = vld [vmem:[#allocation7 + $0x1d0] ss:$8 sps:$4 sm:$0xff]  }
 0x17b   :  { %1949 = vmatprep.subr.bf16.mxu1 %v3422_v53  ;;  %v3517_v53 = vld [vmem:[#allocation7 + $0x1e4] ss:$8 sps:$4 sm:$0xff]  }
 0x17e   :  { %1950 = vmatpush1.bf16.msra.mxu1 %v3420_v55  ;;  %v3520_v55 = vld [vmem:[#allocation7 + $0x1f4] ss:$8 sps:$4 sm:$0xff]  }
 0x17f   :  { %2901 = vmatprep.subr.msk.bf16.mxu1 %vm1623_vm1, %v2898_v56  ;;  %v3518_v56 = vld [vmem:[#allocation7 + $0x1f0] ss:$8 sps:$4 sm:$0xff]  }
 0x182   :  { %1952 = vmatpush1.bf16.msra.mxu1 %v1631_v58  ;;  %v363_v58 = vsub.s32 3, %v3792_v60 }
 0x183   :  { %2984 = vmatprep.subr.bf16.mxu1 %v3521_v4 }
 0x185   :  { %1956 = vmatmul.mubr.bf16.vlgmr.msra.gmra.mrb[4].mxu1 %v3760_v6  ;;  %v356_v6 = vrot.slane %v3798_v62, %v355_v63 }
 0x186   :  { %2985 = vmatpush3.bf16.msra.mxu1 %v3522_v5 }
 0x187   :  { %2986 = vmatprep.subr.bf16.mxu1 %v3523_v7 }
 0x18a   :  { %2987 = vmatpush3.bf16.msra.mxu1 %v3524_v14  ;;  %v3535_v14 = vld [vmem:[#allocation8 + $0x78] sm:$0xff]  }
 0x18b   :  { %2988 = vmatprep.subr.bf16.mxu1 %v3525_v16 }
 0x18e   :  { %2989 = vmatpush3.bf16.msra.mxu1 %v3526_v21 }
 0x18f   :  { %2990 = vmatprep.subr.bf16.mxu1 %v3527_v25 }
 0x192   :  { %2991 = vmatpush3.bf16.msra.mxu1 %v3528_v27 }
 0x193   :  { %2992 = vmatprep.subr.bf16.mxu1 %v3529_v29 }
 0x196   :  { %2993 = vmatpush3.bf16.msra.mxu1 %v3530_v31 }
 0x197   :  { %2994 = vmatprep.subr.bf16.mxu1 %v3531_v32 }
 0x1df   :  { %v1752_v1 = vpop.f32.mrb[0].mxu0 }
 0x1e0   :  { %v3006_v2 = vadd.f32 %v1752_v1, %v352_v0  ;;  %v1754_v3 = vpop.f32.mrb[1].mxu0  ;;  %v364_v0 = vrot.slane %v3798_v62, %v363_v58  ;;  %v2036_v62 = vld [vmem:[%s3839_s4] sm:$0x3] }
 0x1e1   :  { %v3008_v8 = vadd.f32 %v1754_v3, %v356_v6  ;;  %v1756_v9 = vpop.f32.mrb[2].mxu0  ;;  %v2041_v16 = vrot.slane %v2036_v62, %v351_v61  ;;  %v2967_v61 = vld [vmem:[%s3841_s6] ss:$0 sm:$0xff] }
 0x1e2   :  { %v3007_v10 = vadd.f32 %v3006_v2, %v3785_v19  ;;  %v1757_v11 = vpop.f32.mrb[3].mxu0  ;;  %v3482_v19 = vld [vmem:[#allocation7 + $0x130] ss:$8 sps:$4 sm:$0xff]  }
 0x1e3   :  { %v3009_v13 = vadd.f32 %v3008_v8, %v3787_v45  ;;  %v3532_v45 = vld [vmem:[#allocation8 + $0x28] sm:$0xff]   ;;  %v3533_v11 = vld [vmem:[#allocation8 + $0x70] sm:$0xff]  }
 0x1e4   :  { %v1964_v15 = vmax.f32 %v3007_v10, 0.0  ;;  %2995 = vmatpush3.bf16.msra.mxu1 %v3532_v45 }
 0x1e5   :  { %v1965_v17 = vmax.f32 %v3009_v13, 0.0  ;;  %v3534_v13 = vld [vmem:[#allocation8 + $0x30] sm:$0xff]   ;;  %2996 = vmatprep.subr.bf16.mxu1 %v3533_v11 }
 0x1e6   :  { %v1968_v22 = vpack.c.bf16 %v1964_v15, %v1964_v15  ;;  %v3536_v15 = vld [vmem:[#allocation8 + $0x38] sm:$0xff]  }
 0x1e7   :  { %v1969_v18 = vpack.c.bf16 %v1965_v17, %v1965_v17  ;;  %v2045_v17 = vrot.slane %v2036_v62, %v355_v63 }
 0x1e8   :  { %2997 = vmatpush3.bf16.msra.mxu1 %v3534_v13 }
 0x1e9   :  { %2400 = vmatprep.mubr.bf16.mxu0 %v1969_v18  ;;  %2998 = vmatprep.subr.bf16.mxu1 %v3535_v14 }
 0x1ea   :  { %2401 = vmatmul.mubr.bf16.vlgmr.msra.gmra.mrb[4].mxu0 %v1968_v22 }
 0x1eb   :  { %2410 = vmatpush1.bf16.msra.mxu0 %v3473_v20 }
 0x1ec   :  { %2411 = vmatprep.subr.bf16.mxu0 %v3478_v23  ;;  %2999 = vmatpush3.bf16.msra.mxu1 %v3536_v15 }
 0x1ef   :  { %2412 = vmatpush1.bf16.msra.mxu0 %v3476_v26 }
 0x1f0   :  { %2413 = vmatprep.subr.bf16.mxu0 %v3481_v28 }
 0x1f3   :  { %2414 = vmatpush1.bf16.msra.mxu0 %v3479_v30 }
 0x1f4   :  { %2415 = vmatprep.subr.bf16.mxu0 %v3484_v12 }
 0x1f7   :  { %2416 = vmatpush1.bf16.msra.mxu0 %v3482_v19 }
 0x1f8   :  { %2417 = vmatprep.subr.bf16.mxu0 %v3487_v33 }
 0x1fb   :  { %2418 = vmatpush1.bf16.msra.mxu0 %v3485_v34 }
 0x1fc   :  { %2419 = vmatprep.subr.bf16.mxu0 %v3490_v35 }
 0x1ff   :  { %2420 = vmatpush1.bf16.msra.mxu0 %v3488_v36 }
 0x200   :  { %2421 = vmatprep.subr.bf16.mxu0 %v3493_v24 }
 0x203   :  { %2422 = vmatpush1.bf16.msra.mxu0 %v3491_v37 }
 0x204   :  { %2423 = vmatprep.subr.bf16.mxu0 %v3496_v38 }
 0x207   :  { %2424 = vmatpush1.bf16.msra.mxu0 %v3494_v39 }
 0x208   :  { %2425 = vmatprep.subr.bf16.mxu0 %v3499_v40 }
 0x20b   :  { %2426 = vmatpush1.bf16.msra.mxu0 %v3497_v41 }
 0x20c   :  { %2427 = vmatprep.subr.bf16.mxu0 %v3502_v42 }
 0x20f   :  { %2428 = vmatpush1.bf16.msra.mxu0 %v3500_v43 }
 0x210   :  { %2429 = vmatprep.subr.bf16.mxu0 %v3505_v44 }
 0x213   :  { %2430 = vmatpush1.bf16.msra.mxu0 %v3503_v46 }
 0x214   :  { %2431 = vmatprep.subr.bf16.mxu0 %v3508_v47 }
 0x217   :  { %2432 = vmatpush1.bf16.msra.mxu0 %v3506_v48 }
 0x218   :  { %2433 = vmatprep.subr.bf16.mxu0 %v3511_v49 }
 0x21b   :  { %2434 = vmatpush1.bf16.msra.mxu0 %v3509_v50 }
 0x21c   :  { %2435 = vmatprep.subr.bf16.mxu0 %v3514_v51 }
 0x21f   :  { %2436 = vmatpush1.bf16.msra.mxu0 %v3512_v52 }
 0x220   :  { %2437 = vmatprep.subr.bf16.mxu0 %v3517_v53 }
 0x223   :  { %2438 = vmatpush1.bf16.msra.mxu0 %v3515_v54 }
 0x224   :  { %2439 = vmatprep.subr.bf16.mxu0 %v3520_v55 }
 0x227   :  { %2440 = vmatpush1.bf16.msra.mxu0 %v3518_v56 }
 0x258   :  { %v1957_v6 = vpop.f32.mrb[4].mxu1 }
 0x259   :  { %v3010_v1 = vadd.f32 %v1957_v6, %v360_v59  ;;  %v1959_v2 = vpop.f32.mrb[5].mxu1 }
 0x25a   :  { %v3011_v3 = vadd.f32 %v1959_v2, %v364_v0  ;;  %v1961_v4 = vpop.f32.mrb[6].mxu1 }
 0x25b   :  { %v1966_v5 = vmax.f32 %v3010_v1, 0.0  ;;  %v1962_v7 = vpop.f32.mrb[7].mxu1 }
 0x25c   :  { %v1967_v8 = vmax.f32 %v3011_v3, 0.0 }
 0x25d   :  { %v1970_v10 = vpack.c.bf16 %v1966_v5, %v1966_v5 }
 0x25e   :  { %v1971_v9 = vpack.c.bf16 %v1967_v8, %v1967_v8 }
 0x260   :  { %2441 = vmatprep.mubr.bf16.mxu0 %v1971_v9 }
 0x261   :  { %2442 = vmatmul.mubr.bf16.vlgmr.msra.gmra.mrb[4].mxu0 %v1970_v10 }
 0x334   :  { %v2443_v18 = vpop.f32.mrb[4].mxu0 }
 0x335   :  { %v3012_v20 = vadd.f32 %v2443_v18, %v2041_v16  ;;  %v2445_v21 = vpop.f32.mrb[5].mxu0 }
 0x336   :  { %v3013_v22 = vadd.f32 %v2445_v21, %v2045_v17  ;;  %v2447_v23 = vpop.f32.mrb[6].mxu0 }
 0x337   :  { %v2450_v25 = vmax.f32 %v3012_v20, 0.0  ;;  %v2448_v26 = vpop.f32.mrb[7].mxu0 }
 0x338   :  { %v2451_v27 = vmax.f32 %v3013_v22, 0.0 }
 0x339   :  { %v2452_v29 = vpack.c.bf16 %v2450_v25, %v2450_v25 }
 0x33a   :  { %v2453_v28 = vpack.c.bf16 %v2451_v27, %v2451_v27 }
 0x33c   :  { %2621 = vmatprep.mubr.bf16.mxu1 %v2453_v28 }
 0x33d   :  { %2622 = vmatmul.mubr.bf16.vlgmr.msra.gmra.mrb[8].mxu1 %v2452_v29 }
 0x410   :  { %v3000_v30 = vpop.f32.mrb[8].mxu1 }
 0x411   :  { %v3001_v31 = vpop.f32.mrb[9].mxu1 }
 0x412   :  { %v3002_v60 = vadd.f32 %v3001_v31, %v3000_v30  ;;  %v3003_v63 = vpop.f32.mrb[10].mxu1 }
 0x413   :  { %v3004_v12 = vpop.f32.mrb[11].mxu1 }
 0x414   :  { %v2624_v32 = vadd.f32 %v3002_v60, %v2967_v61 }
 0x416   :  { %2629 = vst [vmem:[#allocation10] sm:$0xff] %v2624_v32 }
 0x417   :  { %3636 = shalt.err (!%p3633_p8)
}
 0x418   :  { %s3637_s6 = scalar_lea.hbm %s3842_s7, 128 }
 0x419   :  { %p3638_p9 = scmp.ne.s32.totalorder %s3842_s7, %s3637_s6  ;;  %p3641_p10 = scmp.lt.u32.totalorder %s3637_s6, %s3842_s7 }
 0x41b   :  { %p3643_p11 = pnand %p3641_p10, %p3638_p9 }
 0x41d   :  { %3646 = shalt.err (!%p3643_p11)
}
 0x41e   :  { %2639 = dma.vmem_to_hbm [thread:$0]  %s2637_s9, 128, %s3842_s7, [#allocation4]  }
 0x41f   :  { %3653 = dma.done.wait [#allocation4], 128  }
 0x420   :  { %3654 = vsyncadd [#allocation4], 4294967168 }
 0x421   :  { %2643 = vsyncpa [#allocation3], 1 }
 0x422   :  { %2644 = vsyncpa [#allocation6], 1 }
 0x423   :  { %2645 = vsyncpa [#allocation9], 1 }
 0x424   :  { %2646 = vsyncpa [#allocation4], 1 }

</bundles_post_ra>
